<compile_context>
chip_gen: v7x
topology: tpu7x:2x2x1
jax: 0.10.0
libtpu: 0.0.40
codegen_flags: <defaults>
</compile_context>

<pallas_src>
import jax
import jax.numpy as jnp
from jax.experimental import pallas as pl
from jax.experimental.pallas import tpu as pltpu

# ---- model constants --------------------------------------------------------------
FEATURES = 16                  # flattened spatial length S (= H*W of the input)
CH_EXP = 8                     # channel_expanded
N_CLASSES = 2
HIDDEN = 25                    # LSTM hidden size (torch)
HPAD = 32                      # hidden / per-gate width padded to a 32-lane slot
GATES = 4
OUT_PAD = GATES * HPAD         # 128 — lane-dense kernel output width
T_STEPS = FEATURES // 4        # LSTM sequence length (4)
BIAS_W = 512                   # bias slab width (max row width: LSTM bias x 4 steps)


# ---- packed weight slab row layout --------------------------------------------------
def _offsets(sizes):
    out, off = {}, 0
    for name, rows in sizes:
        out[name] = (off, rows)
        off += rows
    return out, off


W128_OFF, W128_ROWS = _offsets((
    ("w1",   FEATURES),   # conv1 center tap, expanded             (16, 128)
    ("f11",  128),        # flow1.conv1   (3,1) banded             (128, 128)
    ("f121", 128),        # flow1.conv2_1 (1,3) block-diag         (128, 128)
    ("f122", 128),        # flow1.conv2_2 (3,1) banded             (128, 128)
    ("f2a",  128),        # flow2[0]      (1,3) block-diag         (128, 128)
    ("sh8",  128),        # shift-by-one-position matrix, C=8      (128, 128)
    ("c2a",  128),        # conv2, f1a input-channel group         (128, 128)
    ("c2b",  128),        # conv2, f1b input-channel group         (128, 128)
    ("c2c",  256),        # conv2, flow2 input-channel group       (256, 128)
    ("whh",  HPAD),       # LSTM weight_hh, gate-padded            (32, 128)
    ("wfc",  128),        # fc, per-timestep packed                (128, 128)
))
W256_OFF, W256_ROWS = _offsets((
    ("f2b",  128),        # flow2[2] (3,1) 8->16 banded            (128, 256)
    ("sh16", 256),        # shift-by-one-position matrix, C=16     (256, 256)
))

# bias slab row indices
B_C1, B_F11, B_F121, B_F122, B_F2A, B_F2B, B_C2, B_LSTM, B_FC = range(9)


# ---- kernel -------------------------------------------------------------------------
def cnn_lstm_kernel(x_ref, w128_ref, w256_ref, wih_ref, bias_ref, out_ref):
    relu = lambda v: jnp.maximum(v, 0.0)
    mm = lambda a, w: jnp.dot(a, w, preferred_element_type=jnp.float32)

    def w128(name):
        off, rows = W128_OFF[name]
        return w128_ref[pl.ds(off, rows), :]

    def w256(name):
        off, rows = W256_OFF[name]
        return w256_ref[pl.ds(off, rows), :]

    bias = bias_ref[...]                                    # (16, 512)
    bload = lambda row, width: bias[row:row + 1, :width]    # (1, width)

    x = x_ref[...]                                          # (TB, 16) -- BN pre-applied
    TB = x.shape[0]

    # conv1 (1,3)/'same' on width==1 -> center tap, expanded into the lane-dense
    # position-major layout (lane = s*8 + c).
    h = relu(mm(x, w128("w1")) + bload(B_C1, 128))          # (TB, 128)

    # flow1
    f1  = relu(mm(h,  w128("f11"))  + bload(B_F11, 128))    # (3,1) conv, banded weight
    f1a = relu(mm(f1, w128("f121")) + bload(B_F121, 128))   # (1,3) conv -> block-diag
    f1b = relu(mm(f1, w128("f122")) + bload(B_F122, 128))   # (3,1) conv, banded
    # flow2
    f2  = relu(mm(h,  w128("f2a"))  + bload(B_F2A, 128))    # (1,3) conv -> block-diag
    f2  = relu(mm(f2, w256("f2b"))  + bload(B_F2B, 256))    # (3,1) conv 8->16, (TB,256)

    # (2,1)/stride-2 max pools.  shift matrices run on the idle MXU; results stay
    # un-compacted (valid at even position blocks) — downstream weights have zero
    # rows at the odd blocks, so nothing is ever relaid out.
    sh8, sh16 = w128("sh8"), w256("sh16")
    p1a = jnp.maximum(f1a, mm(f1a, sh8))
    p1b = jnp.maximum(f1b, mm(f1b, sh8))
    p2  = jnp.maximum(f2,  mm(f2,  sh16))
    x3  = jnp.maximum(h,   mm(h,   sh8))                    # flow3

    # conv2 (1x1, 32->8): torch's cat([x1, x2], dim=1) folded into three weight slabs
    # summed on the accumulator, plus the flow3 residual.  (relu2 unused in forward.)
    xc = (mm(p1a, w128("c2a")) + mm(p1b, w128("c2b")) + mm(p2, w128("c2c"))
          + bload(B_C2, 128) + x3)                          # (TB, 128)

    # avgpool (2,1)/2 + LSTM input projection fused into one K=128, N=512 matmul:
    # gx[:, t*128 + gate] is the input term of timestep t.
    gx = mm(xc, wih_ref[...]) + bload(B_LSTM, 512)          # (TB, 512)

    # LSTM(8, 25), batch_first, h0 = c0 = 0; gate order i|f|g|o, each padded 25->32.
    whh = w128("whh")                                       # (32, 128)
    hcur = jnp.zeros((TB, HPAD), jnp.float32)
    ccur = jnp.zeros((TB, HPAD), jnp.float32)
    hs = []
    for t in range(T_STEPS):                                # static unroll, T = 4
        g = gx[:, t * 128:(t + 1) * 128]
        if t > 0:                                           # h_0 == 0
            g = g + mm(hcur, whh)
        sg = jax.nn.sigmoid(g)                              # one 128-lane sigmoid
        i_g = sg[:, 0:HPAD]
        f_g = sg[:, HPAD:2 * HPAD]
        o_g = sg[:, 3 * HPAD:4 * HPAD]
        g_g = jnp.tanh(g[:, 2 * HPAD:3 * HPAD])             # one 32-lane tanh
        ccur = f_g * ccur + i_g * g_g                       # padded columns stay 0
        hcur = o_g * jnp.tanh(ccur)
        hs.append(hcur)

    # fc: Linear(4*25 -> 2) as a single K=128 matmul; classes live in out[:, :2].
    hs = jnp.concatenate(hs, axis=1)                        # (TB, 128)
    out_ref[...] = mm(hs, w128("wfc")) + bload(B_FC, 128)


# ---- weight packing -----------------------------------------------------------------
def _pad_gates(a):
    """Last axis 4*25 -> 4*32: zero-pad each gate block 25 -> 32."""
    pads = [(0, 0)] * (a.ndim - 1) + [(0, HPAD - HIDDEN)]
    return jnp.concatenate(
        [jnp.pad(a[..., q * HIDDEN:(q + 1) * HIDDEN], pads) for q in range(GATES)],
        axis=-1)


def _banded_3tap(w):
    """(3,1) conv along the position axis, 'same' zero pad, as one block-banded weight.
       w: torch Conv2d weight (Co, Ci, 3, 1)  ->  (S*Ci, S*Co) with
       W[(s+k-1)*Ci+ci, s*Co+co] = w[co, ci, k, 0]  (cross-correlation)."""
    co, ci = int(w.shape[0]), int(w.shape[1])
    acc = jnp.zeros((FEATURES * ci, FEATURES * co), jnp.float32)
    for k in range(3):
        acc = acc + jnp.kron(jnp.eye(FEATURES, k=1 - k, dtype=jnp.float32),
                             jnp.transpose(w[:, :, k, 0]).astype(jnp.float32))
    return acc


def init_params(key):
    """Deterministic synthetic parameters generated in torch layouts and converted to
    the packed lane-dense slabs described above."""
    ks = iter(jax.random.split(key, 24))

    def rnd(shape, scale=0.2):
        return (scale * jax.random.normal(next(ks), shape)).astype(jnp.float32)

    S, Cx = FEATURES, CH_EXP
    eye_s = jnp.eye(S, dtype=jnp.float32)
    eye_even = jnp.diag(jnp.tile(jnp.array([1.0, 0.0], jnp.float32), S // 2))  # (16,16)

    # ---- torch-layout parameters ----
    bn_g = jnp.ones((), jnp.float32)                 # BatchNorm2d(1) default init
    bn_b = jnp.zeros((), jnp.float32)
    c1_w,   c1_b   = rnd((Cx, 1, 1, 3)),      rnd((Cx,))        # conv1 (1,3)
    f1c1_w, f1c1_b = rnd((Cx, Cx, 3, 1)),     rnd((Cx,))        # flow1.conv1
    f1c21_w, f1c21_b = rnd((Cx, Cx, 1, 3)),   rnd((Cx,))        # flow1.conv2_1
    f1c22_w, f1c22_b = rnd((Cx, Cx, 3, 1)),   rnd((Cx,))        # flow1.conv2_2
    f2a_w,  f2a_b  = rnd((Cx, Cx, 1, 3)),     rnd((Cx,))        # flow2[0]
    f2b_w,  f2b_b  = rnd((2 * Cx, Cx, 3, 1)), rnd((2 * Cx,))    # flow2[2]
    c2_w,   c2_b   = rnd((Cx, 4 * Cx, 1, 1)), rnd((Cx,))        # conv2 (1x1)
    w_ih, w_hh = rnd((4 * HIDDEN, Cx)), rnd((4 * HIDDEN, HIDDEN))
    b_ih, b_hh = rnd((4 * HIDDEN,)),    rnd((4 * HIDDEN,))
    fc_w, fc_b = rnd((N_CLASSES, T_STEPS * HIDDEN)), rnd((N_CLASSES,))

    # ---- packed lane-dense weights ----
    W1    = jnp.kron(eye_s, c1_w[:, 0, 0, 1][None, :])                    # (16, 128)
    Wf11  = _banded_3tap(f1c1_w)                                          # (128, 128)
    Wf121 = jnp.kron(eye_s, jnp.transpose(f1c21_w[:, :, 0, 1]))           # (128, 128)
    Wf122 = _banded_3tap(f1c22_w)                                         # (128, 128)
    Wf2a  = jnp.kron(eye_s, jnp.transpose(f2a_w[:, :, 0, 1]))             # (128, 128)
    Wf2b  = _banded_3tap(f2b_w)                                           # (128, 256)
    SH8   = jnp.eye(S * Cx, k=-Cx, dtype=jnp.float32)                     # v@SH8 -> v[i+8]
    SH16  = jnp.eye(S * 2 * Cx, k=-2 * Cx, dtype=jnp.float32)             # v@SH16 -> v[i+16]
    cw2   = c2_w[:, :, 0, 0]                                              # (8, 32)
    W2a   = jnp.kron(eye_even, jnp.transpose(cw2[:, 0:Cx]))               # (128, 128)
    W2b   = jnp.kron(eye_even, jnp.transpose(cw2[:, Cx:2 * Cx]))          # (128, 128)
    W2c   = jnp.kron(eye_even, jnp.transpose(cw2[:, 2 * Cx:4 * Cx]))      # (256, 128)

    # avgpool folded into the LSTM input projection: position block 2t' feeds step
    # t = t'//2 with weight 0.5 * W_ih (gate-padded).
    w_ih_pad = _pad_gates(jnp.transpose(w_ih))                            # (8, 128)
    M = jnp.zeros((S, T_STEPS), jnp.float32)
    for t in range(T_STEPS):
        M = M.at[4 * t, t].set(0.5)
        M = M.at[4 * t + 2, t].set(0.5)
    Wih_pool = jnp.kron(M, w_ih_pad)                                      # (128, 512)
    Whh_pad = jnp.pad(_pad_gates(jnp.transpose(w_hh)),
                      ((0, HPAD - HIDDEN), (0, 0)))                       # (32, 128)

    fct = jnp.transpose(fc_w)                                             # (100, 2)
    Wfc = jnp.concatenate(
        [jnp.pad(fct[t * HIDDEN:(t + 1) * HIDDEN, :],
                 ((0, HPAD - HIDDEN), (0, OUT_PAD - N_CLASSES)))
         for t in range(T_STEPS)], axis=0)                                # (128, 128)

    w128 = jnp.concatenate(
        [W1, Wf11, Wf121, Wf122, Wf2a, SH8, W2a, W2b, W2c, Whh_pad, Wfc], axis=0)
    assert w128.shape == (W128_ROWS, 128)
    w256 = jnp.concatenate([Wf2b, SH16], axis=0)
    assert w256.shape == (W256_ROWS, 256)

    def brow(v):
        v = jnp.asarray(v, jnp.float32).reshape(-1)
        return jnp.pad(v, (0, BIAS_W - v.shape[0]))

    b_lstm = _pad_gates(b_ih + b_hh)                                      # (128,)
    bias = jnp.stack(
        [brow(jnp.tile(c1_b, S)),            # 0 conv1
         brow(jnp.tile(f1c1_b, S)),          # 1 flow1.conv1
         brow(jnp.tile(f1c21_b, S)),         # 2 flow1.conv2_1
         brow(jnp.tile(f1c22_b, S)),         # 3 flow1.conv2_2
         brow(jnp.tile(f2a_b, S)),           # 4 flow2[0]
         brow(jnp.tile(f2b_b, S)),           # 5 flow2[2]           (256 wide)
         brow(jnp.tile(c2_b, S)),            # 6 conv2
         brow(jnp.tile(b_lstm, T_STEPS)),    # 7 LSTM bias, 4 steps (512 wide)
         brow(jnp.pad(fc_b, (0, OUT_PAD - N_CLASSES)))]                   # 8 fc
        + [jnp.zeros((BIAS_W,), jnp.float32)] * 7, axis=0)                # (16, 512)

    return dict(bn_g=bn_g, bn_b=bn_b, w128=w128, w256=w256, wih=Wih_pool, bias=bias)


# ---- wrapper ------------------------------------------------------------------------
def _round_up(a, m):
    return -(-a // m) * m


def _vmem_capacity_bytes():
    try:
        return int(pltpu.get_tpu_info().vmem_capacity_bytes)
    except Exception:
        return 64 << 20          # conservative: v7x per-TensorCore VMEM


def _choose_batch_tile(B, cap):
    """Few, fat batch tiles: amortize per-grid-step overhead and give the MXU a tall M.
    Keeps >=2 grid steps for large batches so ('parallel',) shards v7x's 2 TCs."""
    if B <= 8:
        return B
    n_tiles = max(-(-B // cap), 2 if B >= 256 else 1)
    return _round_up(-(-B // n_tiles), 8)


def cnn_lstm_forward(x_nchw, p, *, block_batch=None):
    B, C, Hh, Ww = x_nchw.shape
    assert C == 1, "kernel models the default channel=1 configuration"
    S = C * Hh * Ww
    assert S == FEATURES
    x = x_nchw.reshape(B, S).astype(jnp.float32)

    # BatchNorm2d(1), training-mode batch statistics (biased var, eps=1e-5) over the
    # FULL batch, applied as a scalar affine before the kernel (channel == 1), so batch
    # tiling inside the kernel cannot change the statistics.
    mean = jnp.mean(x)
    var = jnp.mean(jnp.square(x - mean))
    x = (x - mean) * (p["bn_g"] * jax.lax.rsqrt(var + 1e-5)) + p["bn_b"]

    # ---- generation-aware batch tiling ----
    vmem = _vmem_capacity_bytes()
    if vmem >= (100 << 20):          # v5e / v6e: 128 MiB VMEM, single TensorCore
        cap, vmem_limit = 2048, 96 << 20
    else:                            # v7x: 64 MiB VMEM per TensorCore, 2 TCs
        cap, vmem_limit = 1024, 48 << 20
    TB = _choose_batch_tile(B, cap) if block_batch is None else int(block_batch)
    assert TB == B or TB % 8 == 0, "batch tile must be the full batch or a multiple of 8"
    Bp = _round_up(B, TB)
    if Bp != B:                      # pad ragged batches; padded rows are discarded
        x = jnp.pad(x, ((0, Bp - B), (0, 0)))

    in_specs = [
        pl.BlockSpec((TB, S), lambda b: (b, 0)),
        pl.BlockSpec(p["w128"].shape, lambda b: (0, 0)),   # weight slabs stay resident
        pl.BlockSpec(p["w256"].shape, lambda b: (0, 0)),
        pl.BlockSpec(p["wih"].shape, lambda b: (0, 0)),
        pl.BlockSpec(p["bias"].shape, lambda b: (0, 0)),
    ]
    cp_kwargs = dict(dimension_semantics=("parallel",))
    if TB >= 512:                    # only raise the scoped-VMEM limit for fat tiles
        cp_kwargs["vmem_limit_bytes"] = vmem_limit

    out_pad = pl.pallas_call(
        cnn_lstm_kernel,
        out_shape=jax.ShapeDtypeStruct((Bp, OUT_PAD), jnp.float32),
        grid=(Bp // TB,),
        in_specs=in_specs,
        out_specs=pl.BlockSpec((TB, OUT_PAD), lambda b: (b, 0)),
        compiler_params=pltpu.CompilerParams(**cp_kwargs),
    )(x, p["w128"], p["w256"], p["wih"], p["bias"])
    return out_pad[:B, :N_CLASSES]


if __name__ == "__main__":
    key = jax.random.PRNGKey(0)
    kx, kp = jax.random.split(key)
    # features=16 -> (batch=16, channel=1, 4, 4)
    x = jax.random.normal(kx, (16, 1, 4, 4), dtype=jnp.float32)
    params = init_params(kp)

    out = cnn_lstm_forward(x, params)
    out = jax.block_until_ready(out)
    assert out.shape == (16, N_CLASSES) and out.dtype == jnp.float32
    assert bool(jnp.all(jnp.isfinite(out)))
    print("KERNEL_OK")
</pallas_src>

<mosaic_0001>
module attributes {stable_mosaic.version = 11 : i64} {
  func.func @cnn_lstm_kernel(%arg0: i32, %arg1: memref<16x16xf32, #tpu.memory_space<vmem>>, %arg2: memref<1328x128xf32, #tpu.memory_space<vmem>>, %arg3: memref<384x256xf32, #tpu.memory_space<vmem>>, %arg4: memref<128x512xf32, #tpu.memory_space<vmem>>, %arg5: memref<16x512xf32, #tpu.memory_space<vmem>>, %arg6: memref<16x128xf32, #tpu.memory_space<vmem>>) attributes {dimension_semantics = [#tpu.dimension_semantics<parallel>], iteration_bounds = array<i64: 1>, scalar_prefetch = 0 : i64, scratch_operands = 0 : i64, tpu.core_type = #tpu.core_type<tc>, window_params = [{transform_indices = @transform_0, window_bounds = array<i64: 16, 16>}, {pipeline_mode = #tpu.pipeline_mode<synchronous>, transform_indices = @transform_1, window_bounds = array<i64: 1328, 128>}, {pipeline_mode = #tpu.pipeline_mode<synchronous>, transform_indices = @transform_2, window_bounds = array<i64: 384, 256>}, {pipeline_mode = #tpu.pipeline_mode<synchronous>, transform_indices = @transform_3, window_bounds = array<i64: 128, 512>}, {pipeline_mode = #tpu.pipeline_mode<synchronous>, transform_indices = @transform_4, window_bounds = array<i64: 16, 512>}, {transform_indices = @transform_5, window_bounds = array<i64: 16, 128>}]} {
    %c0 = arith.constant 0 : index
    %c0_0 = arith.constant 0 : index
    %0 = vector.load %arg5[%c0, %c0_0] : memref<16x512xf32, #tpu.memory_space<vmem>>, vector<16x512xf32>
    %c0_1 = arith.constant 0 : index
    %c0_2 = arith.constant 0 : index
    %1 = vector.load %arg1[%c0_1, %c0_2] : memref<16x16xf32, #tpu.memory_space<vmem>>, vector<16x16xf32>
    %c0_3 = arith.constant 0 : index
    %c0_4 = arith.constant 0 : index
    %2 = vector.load %arg2[%c0_3, %c0_4] : memref<1328x128xf32, #tpu.memory_space<vmem>>, vector<16x128xf32>
    %cst = arith.constant dense<0.000000e+00> : vector<16x128xf32>
    %3 = tpu.matmul %1, %2, %cst {dimension_numbers = #tpu.dot_dimension_numbers<[1], [0], [0], [1], [0, 0, 1, 1], [], []>} : vector<16x16xf32>, vector<16x128xf32>, vector<16x128xf32> -> vector<16x128xf32>
    %4 = vector.extract_strided_slice %0 {offsets = [0, 0], sizes = [1, 128], strides = [1, 1]} : vector<16x512xf32> to vector<1x128xf32>
    %5 = vector.broadcast %4 : vector<1x128xf32> to vector<16x128xf32>
    %6 = arith.addf %3, %5 : vector<16x128xf32>
    %cst_5 = arith.constant 0.000000e+00 : f32
    %7 = vector.broadcast %cst_5 : f32 to vector<16x128xf32>
    %8 = arith.maximumf %6, %7 : vector<16x128xf32>
    %c16 = arith.constant 16 : index
    %c0_6 = arith.constant 0 : index
    %9 = vector.load %arg2[%c16, %c0_6] : memref<1328x128xf32, #tpu.memory_space<vmem>>, vector<128x128xf32>
    %cst_7 = arith.constant dense<0.000000e+00> : vector<16x128xf32>
    %10 = tpu.matmul %8, %9, %cst_7 {dimension_numbers = #tpu.dot_dimension_numbers<[1], [0], [0], [1], [0, 0, 1, 1], [], []>} : vector<16x128xf32>, vector<128x128xf32>, vector<16x128xf32> -> vector<16x128xf32>
    %11 = vector.extract_strided_slice %0 {offsets = [1, 0], sizes = [1, 128], strides = [1, 1]} : vector<16x512xf32> to vector<1x128xf32>
    %12 = vector.broadcast %11 : vector<1x128xf32> to vector<16x128xf32>
    %13 = arith.addf %10, %12 : vector<16x128xf32>
    %cst_8 = arith.constant 0.000000e+00 : f32
    %14 = vector.broadcast %cst_8 : f32 to vector<16x128xf32>
    %15 = arith.maximumf %13, %14 : vector<16x128xf32>
    %c144 = arith.constant 144 : index
    %c0_9 = arith.constant 0 : index
    %16 = vector.load %arg2[%c144, %c0_9] : memref<1328x128xf32, #tpu.memory_space<vmem>>, vector<128x128xf32>
    %cst_10 = arith.constant dense<0.000000e+00> : vector<16x128xf32>
    %17 = tpu.matmul %15, %16, %cst_10 {dimension_numbers = #tpu.dot_dimension_numbers<[1], [0], [0], [1], [0, 0, 1, 1], [], []>} : vector<16x128xf32>, vector<128x128xf32>, vector<16x128xf32> -> vector<16x128xf32>
    %18 = vector.extract_strided_slice %0 {offsets = [2, 0], sizes = [1, 128], strides = [1, 1]} : vector<16x512xf32> to vector<1x128xf32>
    %19 = vector.broadcast %18 : vector<1x128xf32> to vector<16x128xf32>
    %20 = arith.addf %17, %19 : vector<16x128xf32>
    %cst_11 = arith.constant 0.000000e+00 : f32
    %21 = vector.broadcast %cst_11 : f32 to vector<16x128xf32>
    %22 = arith.maximumf %20, %21 : vector<16x128xf32>
    %c272 = arith.constant 272 : index
    %c0_12 = arith.constant 0 : index
    %23 = vector.load %arg2[%c272, %c0_12] : memref<1328x128xf32, #tpu.memory_space<vmem>>, vector<128x128xf32>
    %cst_13 = arith.constant dense<0.000000e+00> : vector<16x128xf32>
    %24 = tpu.matmul %15, %23, %cst_13 {dimension_numbers = #tpu.dot_dimension_numbers<[1], [0], [0], [1], [0, 0, 1, 1], [], []>} : vector<16x128xf32>, vector<128x128xf32>, vector<16x128xf32> -> vector<16x128xf32>
    %25 = vector.extract_strided_slice %0 {offsets = [3, 0], sizes = [1, 128], strides = [1, 1]} : vector<16x512xf32> to vector<1x128xf32>
    %26 = vector.broadcast %25 : vector<1x128xf32> to vector<16x128xf32>
    %27 = arith.addf %24, %26 : vector<16x128xf32>
    %cst_14 = arith.constant 0.000000e+00 : f32
    %28 = vector.broadcast %cst_14 : f32 to vector<16x128xf32>
    %29 = arith.maximumf %27, %28 : vector<16x128xf32>
    %c400 = arith.constant 400 : index
    %c0_15 = arith.constant 0 : index
    %30 = vector.load %arg2[%c400, %c0_15] : memref<1328x128xf32, #tpu.memory_space<vmem>>, vector<128x128xf32>
    %cst_16 = arith.constant dense<0.000000e+00> : vector<16x128xf32>
    %31 = tpu.matmul %8, %30, %cst_16 {dimension_numbers = #tpu.dot_dimension_numbers<[1], [0], [0], [1], [0, 0, 1, 1], [], []>} : vector<16x128xf32>, vector<128x128xf32>, vector<16x128xf32> -> vector<16x128xf32>
    %32 = vector.extract_strided_slice %0 {offsets = [4, 0], sizes = [1, 128], strides = [1, 1]} : vector<16x512xf32> to vector<1x128xf32>
    %33 = vector.broadcast %32 : vector<1x128xf32> to vector<16x128xf32>
    %34 = arith.addf %31, %33 : vector<16x128xf32>
    %cst_17 = arith.constant 0.000000e+00 : f32
    %35 = vector.broadcast %cst_17 : f32 to vector<16x128xf32>
    %36 = arith.maximumf %34, %35 : vector<16x128xf32>
    %c0_18 = arith.constant 0 : index
    %c0_19 = arith.constant 0 : index
    %37 = vector.load %arg3[%c0_18, %c0_19] : memref<384x256xf32, #tpu.memory_space<vmem>>, vector<128x256xf32>
    %cst_20 = arith.constant dense<0.000000e+00> : vector<16x256xf32>
    %38 = tpu.matmul %36, %37, %cst_20 {dimension_numbers = #tpu.dot_dimension_numbers<[1], [0], [0], [1], [0, 0, 1, 1], [], []>} : vector<16x128xf32>, vector<128x256xf32>, vector<16x256xf32> -> vector<16x256xf32>
    %39 = vector.extract_strided_slice %0 {offsets = [5, 0], sizes = [1, 256], strides = [1, 1]} : vector<16x512xf32> to vector<1x256xf32>
    %40 = vector.broadcast %39 : vector<1x256xf32> to vector<16x256xf32>
    %41 = arith.addf %38, %40 : vector<16x256xf32>
    %cst_21 = arith.constant 0.000000e+00 : f32
    %42 = vector.broadcast %cst_21 : f32 to vector<16x256xf32>
    %43 = arith.maximumf %41, %42 : vector<16x256xf32>
    %c528 = arith.constant 528 : index
    %c0_22 = arith.constant 0 : index
    %44 = vector.load %arg2[%c528, %c0_22] : memref<1328x128xf32, #tpu.memory_space<vmem>>, vector<128x128xf32>
    %c128 = arith.constant 128 : index
    %c0_23 = arith.constant 0 : index
    %45 = vector.load %arg3[%c128, %c0_23] : memref<384x256xf32, #tpu.memory_space<vmem>>, vector<256x256xf32>
    %cst_24 = arith.constant dense<0.000000e+00> : vector<16x128xf32>
    %46 = tpu.matmul %22, %44, %cst_24 {dimension_numbers = #tpu.dot_dimension_numbers<[1], [0], [0], [1], [0, 0, 1, 1], [], []>} : vector<16x128xf32>, vector<128x128xf32>, vector<16x128xf32> -> vector<16x128xf32>
    %47 = arith.maximumf %22, %46 : vector<16x128xf32>
    %cst_25 = arith.constant dense<0.000000e+00> : vector<16x128xf32>
    %48 = tpu.matmul %29, %44, %cst_25 {dimension_numbers = #tpu.dot_dimension_numbers<[1], [0], [0], [1], [0, 0, 1, 1], [], []>} : vector<16x128xf32>, vector<128x128xf32>, vector<16x128xf32> -> vector<16x128xf32>
    %49 = arith.maximumf %29, %48 : vector<16x128xf32>
    %cst_26 = arith.constant dense<0.000000e+00> : vector<16x256xf32>
    %50 = tpu.matmul %43, %45, %cst_26 {dimension_numbers = #tpu.dot_dimension_numbers<[1], [0], [0], [1], [0, 0, 1, 1], [], []>} : vector<16x256xf32>, vector<256x256xf32>, vector<16x256xf32> -> vector<16x256xf32>
    %51 = arith.maximumf %43, %50 : vector<16x256xf32>
    %cst_27 = arith.constant dense<0.000000e+00> : vector<16x128xf32>
    %52 = tpu.matmul %8, %44, %cst_27 {dimension_numbers = #tpu.dot_dimension_numbers<[1], [0], [0], [1], [0, 0, 1, 1], [], []>} : vector<16x128xf32>, vector<128x128xf32>, vector<16x128xf32> -> vector<16x128xf32>
    %53 = arith.maximumf %8, %52 : vector<16x128xf32>
    %c656 = arith.constant 656 : index
    %c0_28 = arith.constant 0 : index
    %54 = vector.load %arg2[%c656, %c0_28] : memref<1328x128xf32, #tpu.memory_space<vmem>>, vector<128x128xf32>
    %cst_29 = arith.constant dense<0.000000e+00> : vector<16x128xf32>
    %55 = tpu.matmul %47, %54, %cst_29 {dimension_numbers = #tpu.dot_dimension_numbers<[1], [0], [0], [1], [0, 0, 1, 1], [], []>} : vector<16x128xf32>, vector<128x128xf32>, vector<16x128xf32> -> vector<16x128xf32>
    %c784 = arith.constant 784 : index
    %c0_30 = arith.constant 0 : index
    %56 = vector.load %arg2[%c784, %c0_30] : memref<1328x128xf32, #tpu.memory_space<vmem>>, vector<128x128xf32>
    %cst_31 = arith.constant dense<0.000000e+00> : vector<16x128xf32>
    %57 = tpu.matmul %49, %56, %cst_31 {dimension_numbers = #tpu.dot_dimension_numbers<[1], [0], [0], [1], [0, 0, 1, 1], [], []>} : vector<16x128xf32>, vector<128x128xf32>, vector<16x128xf32> -> vector<16x128xf32>
    %58 = arith.addf %55, %57 : vector<16x128xf32>
    %c912 = arith.constant 912 : index
    %c0_32 = arith.constant 0 : index
    %59 = vector.load %arg2[%c912, %c0_32] : memref<1328x128xf32, #tpu.memory_space<vmem>>, vector<256x128xf32>
    %cst_33 = arith.constant dense<0.000000e+00> : vector<16x128xf32>
    %60 = tpu.matmul %51, %59, %cst_33 {dimension_numbers = #tpu.dot_dimension_numbers<[1], [0], [0], [1], [0, 0, 1, 1], [], []>} : vector<16x256xf32>, vector<256x128xf32>, vector<16x128xf32> -> vector<16x128xf32>
    %61 = arith.addf %58, %60 : vector<16x128xf32>
    %62 = vector.extract_strided_slice %0 {offsets = [6, 0], sizes = [1, 128], strides = [1, 1]} : vector<16x512xf32> to vector<1x128xf32>
    %63 = vector.broadcast %62 : vector<1x128xf32> to vector<16x128xf32>
    %64 = arith.addf %61, %63 : vector<16x128xf32>
    %65 = arith.addf %64, %53 : vector<16x128xf32>
    %c0_34 = arith.constant 0 : index
    %c0_35 = arith.constant 0 : index
    %66 = vector.load %arg4[%c0_34, %c0_35] : memref<128x512xf32, #tpu.memory_space<vmem>>, vector<128x512xf32>
    %cst_36 = arith.constant dense<0.000000e+00> : vector<16x512xf32>
    %67 = tpu.matmul %65, %66, %cst_36 {dimension_numbers = #tpu.dot_dimension_numbers<[1], [0], [0], [1], [0, 0, 1, 1], [], []>} : vector<16x128xf32>, vector<128x512xf32>, vector<16x512xf32> -> vector<16x512xf32>
    %68 = vector.extract_strided_slice %0 {offsets = [7, 0], sizes = [1, 512], strides = [1, 1]} : vector<16x512xf32> to vector<1x512xf32>
    %69 = vector.broadcast %68 : vector<1x512xf32> to vector<16x512xf32>
    %70 = arith.addf %67, %69 : vector<16x512xf32>
    %c1168 = arith.constant 1168 : index
    %c0_37 = arith.constant 0 : index
    %71 = vector.load %arg2[%c1168, %c0_37] : memref<1328x128xf32, #tpu.memory_space<vmem>>, vector<32x128xf32>
    %cst_38 = arith.constant 0.000000e+00 : f32
    %72 = vector.broadcast %cst_38 : f32 to vector<16x32xf32>
    %73 = vector.extract_strided_slice %70 {offsets = [0, 0], sizes = [16, 128], strides = [1, 1]} : vector<16x512xf32> to vector<16x128xf32>
    %74 = arith.negf %73 : vector<16x128xf32>
    %75 = math.exp %74 : vector<16x128xf32>
    %cst_39 = arith.constant 1.000000e+00 : f32
    %76 = vector.broadcast %cst_39 : f32 to vector<16x128xf32>
    %77 = arith.addf %76, %75 : vector<16x128xf32>
    %78 = arith.divf %76, %77 : vector<16x128xf32>
    %79 = vector.extract_strided_slice %78 {offsets = [0, 0], sizes = [16, 32], strides = [1, 1]} : vector<16x128xf32> to vector<16x32xf32>
    %80 = vector.extract_strided_slice %78 {offsets = [0, 32], sizes = [16, 32], strides = [1, 1]} : vector<16x128xf32> to vector<16x32xf32>
    %81 = vector.extract_strided_slice %78 {offsets = [0, 96], sizes = [16, 32], strides = [1, 1]} : vector<16x128xf32> to vector<16x32xf32>
    %82 = vector.extract_strided_slice %73 {offsets = [0, 64], sizes = [16, 32], strides = [1, 1]} : vector<16x128xf32> to vector<16x32xf32>
    %83 = math.tanh %82 : vector<16x32xf32>
    %84 = arith.mulf %80, %72 : vector<16x32xf32>
    %85 = arith.mulf %79, %83 : vector<16x32xf32>
    %86 = arith.addf %84, %85 : vector<16x32xf32>
    %87 = math.tanh %86 : vector<16x32xf32>
    %88 = arith.mulf %81, %87 : vector<16x32xf32>
    %89 = vector.extract_strided_slice %70 {offsets = [0, 128], sizes = [16, 128], strides = [1, 1]} : vector<16x512xf32> to vector<16x128xf32>
    %cst_40 = arith.constant dense<0.000000e+00> : vector<16x128xf32>
    %90 = tpu.matmul %88, %71, %cst_40 {dimension_numbers = #tpu.dot_dimension_numbers<[1], [0], [0], [1], [0, 0, 1, 1], [], []>} : vector<16x32xf32>, vector<32x128xf32>, vector<16x128xf32> -> vector<16x128xf32>
    %91 = arith.addf %89, %90 : vector<16x128xf32>
    %92 = arith.negf %91 : vector<16x128xf32>
    %93 = math.exp %92 : vector<16x128xf32>
    %cst_41 = arith.constant 1.000000e+00 : f32
    %94 = vector.broadcast %cst_41 : f32 to vector<16x128xf32>
    %95 = arith.addf %94, %93 : vector<16x128xf32>
    %96 = arith.divf %94, %95 : vector<16x128xf32>
    %97 = vector.extract_strided_slice %96 {offsets = [0, 0], sizes = [16, 32], strides = [1, 1]} : vector<16x128xf32> to vector<16x32xf32>
    %98 = vector.extract_strided_slice %96 {offsets = [0, 32], sizes = [16, 32], strides = [1, 1]} : vector<16x128xf32> to vector<16x32xf32>
    %99 = vector.extract_strided_slice %96 {offsets = [0, 96], sizes = [16, 32], strides = [1, 1]} : vector<16x128xf32> to vector<16x32xf32>
    %100 = vector.extract_strided_slice %91 {offsets = [0, 64], sizes = [16, 32], strides = [1, 1]} : vector<16x128xf32> to vector<16x32xf32>
    %101 = math.tanh %100 : vector<16x32xf32>
    %102 = arith.mulf %98, %86 : vector<16x32xf32>
    %103 = arith.mulf %97, %101 : vector<16x32xf32>
    %104 = arith.addf %102, %103 : vector<16x32xf32>
    %105 = math.tanh %104 : vector<16x32xf32>
    %106 = arith.mulf %99, %105 : vector<16x32xf32>
    %107 = vector.extract_strided_slice %70 {offsets = [0, 256], sizes = [16, 128], strides = [1, 1]} : vector<16x512xf32> to vector<16x128xf32>
    %cst_42 = arith.constant dense<0.000000e+00> : vector<16x128xf32>
    %108 = tpu.matmul %106, %71, %cst_42 {dimension_numbers = #tpu.dot_dimension_numbers<[1], [0], [0], [1], [0, 0, 1, 1], [], []>} : vector<16x32xf32>, vector<32x128xf32>, vector<16x128xf32> -> vector<16x128xf32>
    %109 = arith.addf %107, %108 : vector<16x128xf32>
    %110 = arith.negf %109 : vector<16x128xf32>
    %111 = math.exp %110 : vector<16x128xf32>
    %cst_43 = arith.constant 1.000000e+00 : f32
    %112 = vector.broadcast %cst_43 : f32 to vector<16x128xf32>
    %113 = arith.addf %112, %111 : vector<16x128xf32>
    %114 = arith.divf %112, %113 : vector<16x128xf32>
    %115 = vector.extract_strided_slice %114 {offsets = [0, 0], sizes = [16, 32], strides = [1, 1]} : vector<16x128xf32> to vector<16x32xf32>
    %116 = vector.extract_strided_slice %114 {offsets = [0, 32], sizes = [16, 32], strides = [1, 1]} : vector<16x128xf32> to vector<16x32xf32>
    %117 = vector.extract_strided_slice %114 {offsets = [0, 96], sizes = [16, 32], strides = [1, 1]} : vector<16x128xf32> to vector<16x32xf32>
    %118 = vector.extract_strided_slice %109 {offsets = [0, 64], sizes = [16, 32], strides = [1, 1]} : vector<16x128xf32> to vector<16x32xf32>
    %119 = math.tanh %118 : vector<16x32xf32>
    %120 = arith.mulf %116, %104 : vector<16x32xf32>
    %121 = arith.mulf %115, %119 : vector<16x32xf32>
    %122 = arith.addf %120, %121 : vector<16x32xf32>
    %123 = math.tanh %122 : vector<16x32xf32>
    %124 = arith.mulf %117, %123 : vector<16x32xf32>
    %125 = vector.extract_strided_slice %70 {offsets = [0, 384], sizes = [16, 128], strides = [1, 1]} : vector<16x512xf32> to vector<16x128xf32>
    %cst_44 = arith.constant dense<0.000000e+00> : vector<16x128xf32>
    %126 = tpu.matmul %124, %71, %cst_44 {dimension_numbers = #tpu.dot_dimension_numbers<[1], [0], [0], [1], [0, 0, 1, 1], [], []>} : vector<16x32xf32>, vector<32x128xf32>, vector<16x128xf32> -> vector<16x128xf32>
    %127 = arith.addf %125, %126 : vector<16x128xf32>
    %128 = arith.negf %127 : vector<16x128xf32>
    %129 = math.exp %128 : vector<16x128xf32>
    %cst_45 = arith.constant 1.000000e+00 : f32
    %130 = vector.broadcast %cst_45 : f32 to vector<16x128xf32>
    %131 = arith.addf %130, %129 : vector<16x128xf32>
    %132 = arith.divf %130, %131 : vector<16x128xf32>
    %133 = vector.extract_strided_slice %132 {offsets = [0, 0], sizes = [16, 32], strides = [1, 1]} : vector<16x128xf32> to vector<16x32xf32>
    %134 = vector.extract_strided_slice %132 {offsets = [0, 32], sizes = [16, 32], strides = [1, 1]} : vector<16x128xf32> to vector<16x32xf32>
    %135 = vector.extract_strided_slice %132 {offsets = [0, 96], sizes = [16, 32], strides = [1, 1]} : vector<16x128xf32> to vector<16x32xf32>
    %136 = vector.extract_strided_slice %127 {offsets = [0, 64], sizes = [16, 32], strides = [1, 1]} : vector<16x128xf32> to vector<16x32xf32>
    %137 = math.tanh %136 : vector<16x32xf32>
    %138 = arith.mulf %134, %122 : vector<16x32xf32>
    %139 = arith.mulf %133, %137 : vector<16x32xf32>
    %140 = arith.addf %138, %139 : vector<16x32xf32>
    %141 = math.tanh %140 : vector<16x32xf32>
    %142 = arith.mulf %135, %141 : vector<16x32xf32>
    %143 = tpu.concatenate %88, %106, %124, %142 in 1 : vector<16x32xf32>, vector<16x32xf32>, vector<16x32xf32>, vector<16x32xf32> -> vector<16x128xf32>
    %c1200 = arith.constant 1200 : index
    %c0_46 = arith.constant 0 : index
    %144 = vector.load %arg2[%c1200, %c0_46] : memref<1328x128xf32, #tpu.memory_space<vmem>>, vector<128x128xf32>
    %cst_47 = arith.constant dense<0.000000e+00> : vector<16x128xf32>
    %145 = tpu.matmul %143, %144, %cst_47 {dimension_numbers = #tpu.dot_dimension_numbers<[1], [0], [0], [1], [0, 0, 1, 1], [], []>} : vector<16x128xf32>, vector<128x128xf32>, vector<16x128xf32> -> vector<16x128xf32>
    %146 = vector.extract_strided_slice %0 {offsets = [8, 0], sizes = [1, 128], strides = [1, 1]} : vector<16x512xf32> to vector<1x128xf32>
    %147 = vector.broadcast %146 : vector<1x128xf32> to vector<16x128xf32>
    %148 = arith.addf %145, %147 : vector<16x128xf32>
    %c0_48 = arith.constant 0 : index
    %c0_49 = arith.constant 0 : index
    %149 = vector.load %arg6[%c0_48, %c0_49] : memref<16x128xf32, #tpu.memory_space<vmem>>, vector<16x128xf32>
    tpu.vector_store %arg6[%c0_48, %c0_49], %148 {strides = array<i32>} : memref<16x128xf32, #tpu.memory_space<vmem>>, vector<16x128xf32>,
    return
  }
  func.func @transform_0(%arg0: i32) -> (i32, i32) {
    %c0_i32 = arith.constant 0 : i32
    %c0_i32_0 = arith.constant 0 : i32
    return %arg0, %c0_i32 : i32, i32
  }
  func.func @transform_1(%arg0: i32) -> (i32, i32) {
    %c0_i32 = arith.constant 0 : i32
    %c0_i32_0 = arith.constant 0 : i32
    %c0_i32_1 = arith.constant 0 : i32
    return %c0_i32, %c0_i32_0 : i32, i32
  }
  func.func @transform_2(%arg0: i32) -> (i32, i32) {
    %c0_i32 = arith.constant 0 : i32
    %c0_i32_0 = arith.constant 0 : i32
    %c0_i32_1 = arith.constant 0 : i32
    return %c0_i32, %c0_i32_0 : i32, i32
  }
  func.func @transform_3(%arg0: i32) -> (i32, i32) {
    %c0_i32 = arith.constant 0 : i32
    %c0_i32_0 = arith.constant 0 : i32
    %c0_i32_1 = arith.constant 0 : i32
    return %c0_i32, %c0_i32_0 : i32, i32
  }
  func.func @transform_4(%arg0: i32) -> (i32, i32) {
    %c0_i32 = arith.constant 0 : i32
    %c0_i32_0 = arith.constant 0 : i32
    %c0_i32_1 = arith.constant 0 : i32
    return %c0_i32, %c0_i32_0 : i32, i32
  }
  func.func @transform_5(%arg0: i32) -> (i32, i32) {
    %c0_i32 = arith.constant 0 : i32
    %c0_i32_0 = arith.constant 0 : i32
    return %arg0, %c0_i32 : i32, i32
  }
}

</mosaic_0001>

<bundles_post_ra>
// kernel: tpu_custom_call.1
= control target key start
LH: loop header
LB: loop body
LE: loop exit
PB: predicated region body
PF: predicated region fallthrough
CT: control target
= control target key end

     0   :  { %10 = vsyncpa [#allocation3], 0  ;;  %s4092_s0 = inlined_call_operand.hbm [shape: f32[16,16], index: 0, kind: input, shape index: {}]   ;;  %s4093_s1 = inlined_call_operand.hbm [shape: f32[1328,128], index: 1, kind: input, shape index: {}]   ;;  %s4094_s2 = inlined_call_operand.hbm [shape: f32[384,256], index: 2, kind: input, shape index: {}]   ;;  %s4095_s3 = inlined_call_operand.hbm [shape: f32[128,512], index: 3, kind: input, shape index: {}]   ;;  %s4096_s4 = inlined_call_operand.hbm [shape: f32[16,512], index: 4, kind: input, shape index: {}]   ;;  %s4097_s5 = inlined_call_operand.hbm [shape: f32[16,128], index: 5, kind: output, shape index: {}]  }
   0x1   :  { %11 = vsyncpa [#allocation6], 0 }
   0x2   :  { %12 = vsyncpa [#allocation9], 0 }
   0x3   :  { %13 = vsyncpa [#allocation4], 0  ;;  %s3634_s18 = smov [#allocation5]   ;;  %s3635_s20 = smov [#allocation8]  }
   0x4   :  { %s31_s19 = sshll.u32 %s3634_s18, 4  ;;  %s55_s21 = sshll.u32 %s3635_s20, 4  ;;  %s32_s19 = int_to_ptr.vmem [resolvable:$true] %s31_s19  ;;  %s3679_s21 = int_to_ptr.vmem [resolvable:$true] %s55_s21 }
   0x5   :  { %s3494_s24 = scalar_lea.hbm %s4093_s1, 21248 }
   0x6   :  { %p3495_p0 = scmp.ne.s32.totalorder %s4093_s1, %s3494_s24  ;;  %p3498_p1 = scmp.lt.u32.totalorder %s3494_s24, %s4093_s1 }
   0x8   :  { %p3500_p2 = pnand %p3498_p1, %p3495_p0 }
   0xa   :  { %3503 = shalt.err (!%p3500_p2)
}
   0xb   :  { %s3504_s29 = scalar_lea.vmem %s32_s19, 21248  ;;  %p3509_p4 = scmp.lt.s32.totalorder %s32_s19, %s32_s19 }
   0xc   :  { %p3505_p3 = scmp.ne.s32.totalorder %s32_s19, %s3504_s29  ;;  %p3510_p5 = scmp.lt.s32.totalorder %s3504_s29, %s3504_s29 }
   0xe   :  { %p3511_p6 = por %p3510_p5, %p3509_p4 }
  0x10   :  { %p3512_p7 = pnand %p3511_p6, %p3505_p3 }
  0x12   :  { %3515 = shalt.err (!%p3512_p7)
}
  0x13   :  { %s3636_s30 = smov 128   ;;  %s3637_s6 = smov 8  }
  0x14   :  { %37 = dma.hbm_to_vmem [thread:$0]  %s4093_s1, 21248, %s32_s19, [#allocation6], %s3636_s30, %s3636_s30, %s3637_s6  }
  0x15   :  { %s3516_s11 = scalar_lea.hbm %s4095_s3, 8192 }
  0x16   :  { %p3517_p8 = scmp.ne.s32.totalorder %s4095_s3, %s3516_s11  ;;  %p3520_p9 = scmp.lt.u32.totalorder %s3516_s11, %s4095_s3 }
  0x18   :  { %p3522_p10 = pnand %p3520_p9, %p3517_p8 }
  0x1a   :  { %3525 = shalt.err (!%p3522_p10)
}
  0x1b   :  { %s3526_s16 = scalar_lea.vmem %s3679_s21, 8192  ;;  %p3531_p12 = scmp.lt.s32.totalorder %s3679_s21, %s3679_s21 }
  0x1c   :  { %p3527_p11 = scmp.ne.s32.totalorder %s3679_s21, %s3526_s16  ;;  %p3532_p13 = scmp.lt.s32.totalorder %s3526_s16, %s3526_s16 }
  0x1e   :  { %p3533_p0 = por %p3532_p13, %p3531_p12 }
  0x20   :  { %p3534_p1 = pnand %p3533_p0, %p3527_p11 }
  0x22   :  { %3537 = shalt.err (!%p3534_p1)
}
  0x23   :  { %s3638_s1 = smov 512   ;;  %s3639_s17 = smov 32  }
  0x24   :  { %61 = dma.hbm_to_vmem [thread:$0]  %s4095_s3, 8192, %s3679_s21, [#allocation9], %s3638_s1, %s3638_s1, %s3639_s17  }
  0x25   :  { %s3640_s20 = smov [#allocation2]   ;;  %s3641_s23 = smov [#allocation7]  }
  0x26   :  { %s19_s22 = sshll.u32 %s3640_s20, 4  ;;  %s43_s24 = sshll.u32 %s3641_s23, 4  ;;  %s20_s22 = int_to_ptr.vmem [resolvable:$true] %s19_s22  ;;  %s3716_s24 = int_to_ptr.vmem [resolvable:$true] %s43_s24 }
  0x27   :  { %s3538_s27 = scalar_lea.hbm %s4092_s0, 256 }
  0x28   :  { %p3539_p2 = scmp.ne.s32.totalorder %s4092_s0, %s3538_s27  ;;  %p3542_p3 = scmp.lt.u32.totalorder %s3538_s27, %s4092_s0 }
  0x2a   :  { %p3544_p4 = pnand %p3542_p3, %p3539_p2 }
  0x2c   :  { %3547 = shalt.err (!%p3544_p4)
}
  0x2d   :  { %s3548_s3 = scalar_lea.vmem %s20_s22, 256  ;;  %p3553_p6 = scmp.lt.s32.totalorder %s20_s22, %s20_s22 }
  0x2e   :  { %p3549_p5 = scmp.ne.s32.totalorder %s20_s22, %s3548_s3  ;;  %p3554_p7 = scmp.lt.s32.totalorder %s3548_s3, %s3548_s3 }
  0x30   :  { %p3555_p8 = por %p3554_p7, %p3553_p6 }
  0x32   :  { %p3556_p9 = pnand %p3555_p8, %p3549_p5 }
  0x34   :  { %3559 = shalt.err (!%p3556_p9)
}
  0x35   :  { %25 = dma.hbm_to_vmem [thread:$0]  %s4092_s0, 256, %s20_s22, [#allocation3], %s3636_s30, %s3636_s30, %s3637_s6  }
  0x36   :  { %s3560_s12 = scalar_lea.hbm %s4094_s2, 12288 }
  0x37   :  { %p3561_p10 = scmp.ne.s32.totalorder %s4094_s2, %s3560_s12  ;;  %p3564_p11 = scmp.lt.u32.totalorder %s3560_s12, %s4094_s2 }
  0x39   :  { %p3566_p12 = pnand %p3564_p11, %p3561_p10 }
  0x3b   :  { %3569 = shalt.err (!%p3566_p12)
}
  0x3c   :  { %s3570_s18 = scalar_lea.vmem %s3716_s24, 12288  ;;  %p3575_p0 = scmp.lt.s32.totalorder %s3716_s24, %s3716_s24 }
  0x3d   :  { %p3571_p13 = scmp.ne.s32.totalorder %s3716_s24, %s3570_s18  ;;  %p3576_p1 = scmp.lt.s32.totalorder %s3570_s18, %s3570_s18 }
  0x3f   :  { %p3577_p2 = por %p3576_p1, %p3575_p0 }
  0x41   :  { %p3578_p3 = pnand %p3577_p2, %p3571_p13 }
  0x43   :  { %3581 = shalt.err (!%p3578_p3)
}
  0x44   :  { %s3642_s0 = smov 256   ;;  %s3643_s19 = smov 16  }
  0x45   :  { %49 = dma.hbm_to_vmem [thread:$0]  %s4094_s2, 12288, %s3716_s24, [#allocation6], %s3642_s0, %s3642_s0, %s3643_s19  }
  0x46   :  { %s3644_s23 = smov [#allocation10]   ;;  %s3582_s28 = scalar_lea.hbm %s4096_s4, 1024 }
  0x47   :  { %s67_s25 = sshll.u32 %s3644_s23, 4  ;;  %p3583_p4 = scmp.ne.s32.totalorder %s4096_s4, %s3582_s28  ;;  %s68_s25 = int_to_ptr.vmem [resolvable:$true] %s67_s25 }
  0x48   :  { %p3586_p5 = scmp.lt.u32.totalorder %s3582_s28, %s4096_s4 }
  0x4a   :  { %p3588_p6 = pnand %p3586_p5, %p3583_p4 }
  0x4c   :  { %3591 = shalt.err (!%p3588_p6)
}
  0x4d   :  { %s3592_s21 = scalar_lea.vmem %s68_s25, 1024  ;;  %p3597_p8 = scmp.lt.s32.totalorder %s68_s25, %s68_s25 }
  0x4e   :  { %p3593_p7 = scmp.ne.s32.totalorder %s68_s25, %s3592_s21  ;;  %p3598_p9 = scmp.lt.s32.totalorder %s3592_s21, %s3592_s21 }
  0x50   :  { %p3599_p10 = por %p3598_p9, %p3597_p8 }
  0x52   :  { %p3600_p11 = pnand %p3599_p10, %p3593_p7 }
  0x54   :  { %3603 = shalt.err (!%p3600_p11)
}
  0x55   :  { %73 = dma.hbm_to_vmem [thread:$0]  %s4096_s4, 1024, %s68_s25, [#allocation9], %s3638_s1, %s3638_s1, %s3639_s17  }
  0x56   :  { %3626 = dma.done.wait [#allocation3], 256  }
  0x57   :  { %3627 = vsyncadd [#allocation3], 4294967040 }
  0x58   :  { %3628 = dma.done.wait [#allocation6], 33536  }
  0x59   :  { %3629 = vsyncadd [#allocation6], 4294933760 }
  0x5a   :  { %3630 = dma.done.wait [#allocation9], 9216  }
  0x5b   :  { %3631 = vsyncadd [#allocation9], 4294958080  ;;  %vm102_vm0 = vcmask 130048   ;;  %v96_v0 = vld [vmem:[#allocation5] sm:$0xff]  ;;  %v97_v1 = vld [vmem:[#allocation5 + $0x8] sm:$0xff]  ;;  %v98_v53 = vlaneseq  ;;  %s3646_s4 = smov 64  }
  0x5c   :  { %v94_v2 = vld [vmem:[#allocation2] sm:$0xff]  ;;  %v2862_v3 = vpack.c.bf16 %v97_v1, %v96_v0  ;;  %v187_v5 = vld [vmem:[#allocation5 + $0x18] sm:$0xff]  ;;  %v188_v7 = vld [vmem:[#allocation5 + $0x20] sm:$0xff]  ;;  %vm1678_vm1 = vcmask 261120   ;;  %s3647_s1 = smov 96   ;;  %vm2094_vm2 = vcmask 523264  }
  0x5d   :  { %2476 = vmatprep.mubr.msk.f32.mxu1 %vm102_vm0, %v94_v2  ;;  %v186_v4 = vld [vmem:[#allocation5 + $0x10] sm:$0xff]  ;;  %v189_v8 = vld [vmem:[#allocation5 + $0x28] sm:$0xff]  ;;  %v95_v9 = vld [vmem:[#allocation2 + $0x8] sm:$0xff]  ;;  %v3767_v54 = vshrl.u32 %v98_v53, 7  ;;  %vm2097_vm3 = vcmask 785408  }
  0x5e   :  { %v2866_v6 = vpack.c.bf16 %v187_v5, %v186_v4  ;;  %2863 = vmatprep.subr.bf16.mxu1 %v2862_v3  ;;  %v2870_v10 = vpack.c.bf16 %v189_v8, %v188_v7  ;;  %v190_v11 = vld [vmem:[#allocation5 + $0x30] sm:$0xff]  ;;  %v191_v12 = vld [vmem:[#allocation5 + $0x38] sm:$0xff]  ;;  %v192_v14 = vld [vmem:[#allocation5 + $0x40] sm:$0xff] }
  0x5f   :  { %2865 = vmatpush3.bf16.msra.mxu1 %v2862_v3  ;;  %v2874_v13 = vpack.c.bf16 %v191_v12, %v190_v11  ;;  %v193_v15 = vld [vmem:[#allocation5 + $0x48] sm:$0xff]  ;;  %v194_v17 = vld [vmem:[#allocation5 + $0x50] sm:$0xff]  ;;  %v195_v18 = vld [vmem:[#allocation5 + $0x58] sm:$0xff]  ;;  %v100_v55 = vsub.s32 0, %v3767_v54 }
  0x60   :  { %2867 = vmatprep.subr.bf16.mxu1 %v2866_v6  ;;  %v2878_v16 = vpack.c.bf16 %v193_v15, %v192_v14  ;;  %v2882_v19 = vpack.c.bf16 %v195_v18, %v194_v17  ;;  %v196_v20 = vld [vmem:[#allocation5 + $0x60] sm:$0xff]  ;;  %v197_v21 = vld [vmem:[#allocation5 + $0x68] sm:$0xff]  ;;  %v198_v23 = vld [vmem:[#allocation5 + $0x70] sm:$0xff] }
  0x61   :  { %v2886_v22 = vpack.c.bf16 %v197_v21, %v196_v20  ;;  %v199_v24 = vld [vmem:[#allocation5 + $0x78] sm:$0xff]  ;;  %v200_v26 = vld [vmem:[#allocation5 + $0x80] sm:$0xff]  ;;  %v201_v27 = vld [vmem:[#allocation5 + $0x88] sm:$0xff] }
  0x62   :  { %2477 = vmatmul.mubr.msk.f32.vlgmr.msra.gmra.mrb[0].mxu1 %vm102_vm0, %v95_v9  ;;  %v2890_v25 = vpack.c.bf16 %v199_v24, %v198_v23  ;;  %v2894_v28 = vpack.c.bf16 %v201_v27, %v200_v26  ;;  %v283_v29 = vld [vmem:[#allocation5 + $0x90] sm:$0xff]  ;;  %v284_v30 = vld [vmem:[#allocation5 + $0x98] sm:$0xff]  ;;  %v285_v34 = vld [vmem:[#allocation5 + $0xa0] sm:$0xff]  ;;  %v204_v27 = vsub.s32 1, %v3767_v54 }
  0x63   :  { %2869 = vmatpush3.bf16.msra.mxu1 %v2866_v6  ;;  %v380_v31 = vld [vmem:[#allocation5 + $0x110] sm:$0xff]  ;;  %v2898_v32 = vpack.c.bf16 %v284_v30, %v283_v29  ;;  %v381_v33 = vld [vmem:[#allocation5 + $0x118] sm:$0xff]  ;;  %v286_v35 = vld [vmem:[#allocation5 + $0xa8] sm:$0xff] }
  0x64   :  { %2871 = vmatprep.subr.bf16.mxu1 %v2870_v10  ;;  %v2930_v36 = vpack.c.bf16 %v381_v33, %v380_v31  ;;  %v2902_v37 = vpack.c.bf16 %v286_v35, %v285_v34  ;;  %v287_v38 = vld [vmem:[#allocation5 + $0xb0] sm:$0xff]  ;;  %v288_v39 = vld [vmem:[#allocation5 + $0xb8] sm:$0xff]  ;;  %v289_v41 = vld [vmem:[#allocation5 + $0xc0] sm:$0xff] }
  0x65   :  { %2899 = vmatprep.subr.bf16.mxu0 %v2898_v32  ;;  %v2906_v40 = vpack.c.bf16 %v288_v39, %v287_v38  ;;  %v290_v42 = vld [vmem:[#allocation5 + $0xc8] sm:$0xff]  ;;  %v291_v44 = vld [vmem:[#allocation5 + $0xd0] sm:$0xff]  ;;  %v292_v45 = vld [vmem:[#allocation5 + $0xd8] sm:$0xff] }
  0x66   :  { %2901 = vmatpush3.bf16.msra.mxu0 %v2898_v32  ;;  %v2910_v43 = vpack.c.bf16 %v290_v42, %v289_v41  ;;  %v2914_v46 = vpack.c.bf16 %v292_v45, %v291_v44  ;;  %v293_v47 = vld [vmem:[#allocation5 + $0xe0] sm:$0xff]  ;;  %v294_v48 = vld [vmem:[#allocation5 + $0xe8] sm:$0xff]  ;;  %v295_v50 = vld [vmem:[#allocation5 + $0xf0] sm:$0xff] }
  0x67   :  { %2873 = vmatpush3.bf16.msra.mxu1 %v2870_v10  ;;  %2903 = vmatprep.subr.bf16.mxu0 %v2902_v37  ;;  %v2918_v49 = vpack.c.bf16 %v294_v48, %v293_v47  ;;  %v296_v51 = vld [vmem:[#allocation5 + $0xf8] sm:$0xff]  ;;  %v3770_v56 = vld [vmem:[#allocation10] sm:$0xff]  ;;  %v382_v62 = vld [vmem:[#allocation5 + $0x120] sm:$0xff] }
  0x68   :  { %2875 = vmatprep.subr.bf16.mxu1 %v2874_v13  ;;  %v2922_v52 = vpack.c.bf16 %v296_v51, %v295_v50  ;;  %v101_v57 = vrot.slane %v3770_v56, %v100_v55  ;;  %v383_v63 = vld [vmem:[#allocation5 + $0x128] sm:$0xff]  ;;  %v384_v3 = vld [vmem:[#allocation5 + $0x130] sm:$0xff]  ;;  %v385_v4 = vld [vmem:[#allocation5 + $0x138] sm:$0xff] }
  0x69   :  { %v2934_v2 = vpack.c.bf16 %v383_v63, %v382_v62  ;;  %v2938_v5 = vpack.c.bf16 %v385_v4, %v384_v3  ;;  %v386_v6 = vld [vmem:[#allocation5 + $0x140] sm:$0xff]  ;;  %v387_v7 = vld [vmem:[#allocation5 + $0x148] sm:$0xff]  ;;  %v388_v9 = vld [vmem:[#allocation5 + $0x150] sm:$0xff] }
  0x6a   :  { %2905 = vmatpush3.bf16.msra.mxu0 %v2902_v37  ;;  %v2942_v8 = vpack.c.bf16 %v387_v7, %v386_v6  ;;  %v389_v10 = vld [vmem:[#allocation5 + $0x158] sm:$0xff]  ;;  %v390_v12 = vld [vmem:[#allocation5 + $0x160] sm:$0xff]  ;;  %v392_v15 = vld [vmem:[#allocation5 + $0x170] sm:$0xff] }
  0x6b   :  { %2877 = vmatpush3.bf16.msra.mxu1 %v2874_v13  ;;  %2907 = vmatprep.subr.bf16.mxu0 %v2906_v40  ;;  %v2946_v11 = vpack.c.bf16 %v389_v10, %v388_v9  ;;  %v391_v13 = vld [vmem:[#allocation5 + $0x168] sm:$0xff]  ;;  %v297_v18 = vld [vmem:[#allocation5 + $0x100] sm:$0xff]  ;;  %v477_v24 = vld [vmem:[#allocation5 + $0x190] sm:$0xff] }
  0x6c   :  { %2879 = vmatprep.subr.bf16.mxu1 %v2878_v16  ;;  %v2950_v14 = vpack.c.bf16 %v391_v13, %v390_v12  ;;  %v394_v21 = vld [vmem:[#allocation5 + $0x180] sm:$0xff]  ;;  %v480_v34 = vld [vmem:[#allocation5 + $0x1a8] sm:$0xff]  ;;  %v481_v38 = vld [vmem:[#allocation5 + $0x1b0] sm:$0xff] }
  0x6d   :  { %v479_v33 = vld [vmem:[#allocation5 + $0x1a0] sm:$0xff]  ;;  %v482_v39 = vld [vmem:[#allocation5 + $0x1b8] sm:$0xff]  ;;  %v484_v42 = vld [vmem:[#allocation5 + $0x1c8] sm:$0xff] }
  0x6e   :  { %2909 = vmatpush3.bf16.msra.mxu0 %v2906_v40  ;;  %v2966_v37 = vpack.c.bf16 %v480_v34, %v479_v33  ;;  %v2970_v40 = vpack.c.bf16 %v482_v39, %v481_v38  ;;  %v483_v41 = vld [vmem:[#allocation5 + $0x1c0] sm:$0xff]  ;;  %v485_v44 = vld [vmem:[#allocation5 + $0x1d0] sm:$0xff]  ;;  %v486_v45 = vld [vmem:[#allocation5 + $0x1d8] sm:$0xff] }
  0x6f   :  { %2881 = vmatpush3.bf16.msra.mxu1 %v2878_v16  ;;  %2911 = vmatprep.subr.bf16.mxu0 %v2910_v43  ;;  %v393_v16 = vld [vmem:[#allocation5 + $0x178] sm:$0xff]  ;;  %v487_v47 = vld [vmem:[#allocation5 + $0x1e0] sm:$0xff]  ;;  %v488_v48 = vld [vmem:[#allocation5 + $0x1e8] sm:$0xff] }
  0x70   :  { %2883 = vmatprep.subr.bf16.mxu1 %v2882_v19  ;;  %v2954_v17 = vpack.c.bf16 %v393_v16, %v392_v15  ;;  %v489_v50 = vld [vmem:[#allocation5 + $0x1f0] sm:$0xff]  ;;  %v490_v51 = vld [vmem:[#allocation5 + $0x1f8] sm:$0xff]  ;;  %v491_v53 = vld [vmem:[#allocation5 + $0x200] sm:$0xff] }
  0x71   :  { %v697_v62 = vld [vmem:[#allocation5 + $0x220] sm:$0xff]  ;;  %v698_v63 = vld [vmem:[#allocation5 + $0x228] sm:$0xff]  ;;  %v699_v3 = vld [vmem:[#allocation5 + $0x230] sm:$0xff] }
  0x72   :  { %2913 = vmatpush3.bf16.msra.mxu0 %v2910_v43  ;;  %v2974_v43 = vpack.c.bf16 %v484_v42, %v483_v41  ;;  %v700_v4 = vld [vmem:[#allocation5 + $0x238] sm:$0xff]  ;;  %v701_v6 = vld [vmem:[#allocation5 + $0x240] sm:$0xff]  ;;  %v702_v7 = vld [vmem:[#allocation5 + $0x248] sm:$0xff] }
  0x73   :  { %2885 = vmatpush3.bf16.msra.mxu1 %v2882_v19  ;;  %2915 = vmatprep.subr.bf16.mxu0 %v2914_v46  ;;  %v298_v19 = vld [vmem:[#allocation5 + $0x108] sm:$0xff]  ;;  %v703_v9 = vld [vmem:[#allocation5 + $0x250] sm:$0xff]  ;;  %v704_v10 = vld [vmem:[#allocation5 + $0x258] sm:$0xff] }
  0x74   :  { %2887 = vmatprep.subr.bf16.mxu1 %v2886_v22  ;;  %v2926_v20 = vpack.c.bf16 %v298_v19, %v297_v18  ;;  %v705_v12 = vld [vmem:[#allocation5 + $0x260] sm:$0xff]  ;;  %v706_v13 = vld [vmem:[#allocation5 + $0x268] sm:$0xff]  ;;  %v707_v15 = vld [vmem:[#allocation5 + $0x270] sm:$0xff] }
  0x75   :  { %v708_v16 = vld [vmem:[#allocation5 + $0x278] sm:$0xff]  ;;  %v709_v18 = vld [vmem:[#allocation5 + $0x280] sm:$0xff]  ;;  %v710_v19 = vld [vmem:[#allocation5 + $0x288] sm:$0xff] }
  0x76   :  { %2917 = vmatpush3.bf16.msra.mxu0 %v2914_v46  ;;  %v2978_v46 = vpack.c.bf16 %v486_v45, %v485_v44  ;;  %v585_v34 = vld [vmem:[#allocation7 + $0x58] sm:$0xff]  ;;  %v587_v38 = vld [vmem:[#allocation7 + $0x68] sm:$0xff]  ;;  %v586_v42 = vld [vmem:[#allocation7 + $0x60] sm:$0xff] }
  0x77   :  { %2889 = vmatpush3.bf16.msra.mxu1 %v2886_v22  ;;  %2919 = vmatprep.subr.bf16.mxu0 %v2918_v49  ;;  %v395_v22 = vld [vmem:[#allocation5 + $0x188] sm:$0xff]  ;;  %v591_v44 = vld [vmem:[#allocation7 + $0x88] sm:$0xff] }
  0x78   :  { %2891 = vmatprep.subr.bf16.mxu1 %v2890_v25  ;;  %v2958_v23 = vpack.c.bf16 %v395_v22, %v394_v21  ;;  %v575_v21 = vld [vmem:[#allocation7 + $0x8] sm:$0xff]  ;;  %v577_v22 = vld [vmem:[#allocation7 + $0x18] sm:$0xff] }
  0x79   :  { %v589_v39 = vld [vmem:[#allocation7 + $0x78] sm:$0xff] }
  0x7a   :  { %2921 = vmatpush3.bf16.msra.mxu0 %v2918_v49  ;;  %v2982_v49 = vpack.c.bf16 %v488_v48, %v487_v47  ;;  %v3006_v41 = vpack.c.bf16 %v589_v39, %v587_v38  ;;  %v593_v45 = vld [vmem:[#allocation7 + $0x98] sm:$0xff]  ;;  %v590_v48 = vld [vmem:[#allocation7 + $0x80] sm:$0xff]  ;;  %v717_v39 = vld [vmem:[#allocation7 + $0x130] sm:$0xff] }
  0x7b   :  { %2893 = vmatpush3.bf16.msra.mxu1 %v2890_v25  ;;  %2923 = vmatprep.subr.bf16.mxu0 %v2922_v52  ;;  %v478_v25 = vld [vmem:[#allocation5 + $0x198] sm:$0xff]  ;;  %v3010_v47 = vpack.c.bf16 %v593_v45, %v591_v44  ;;  %v715_v38 = vld [vmem:[#allocation7 + $0x120] sm:$0xff]  ;;  %v721_v45 = vld [vmem:[#allocation7 + $0x150] sm:$0xff] }
  0x7c   :  { %2895 = vmatprep.subr.bf16.mxu1 %v2894_v28  ;;  %v2962_v26 = vpack.c.bf16 %v478_v25, %v477_v24  ;;  %v574_v24 = vld [vmem:[#allocation7] sm:$0xff]  ;;  %v576_v25 = vld [vmem:[#allocation7 + $0x10] sm:$0xff] }
  0x7d   :  { %v719_v44 = vld [vmem:[#allocation7 + $0x140] sm:$0xff] }
  0x7e   :  { %2925 = vmatpush3.bf16.msra.mxu0 %v2922_v52  ;;  %v2986_v52 = vpack.c.bf16 %v490_v51, %v489_v50  ;;  %v595_v50 = vld [vmem:[#allocation7 + $0xa8] sm:$0xff]  ;;  %v597_v51 = vld [vmem:[#allocation7 + $0xb8] sm:$0xff] }
  0x7f   :  { %2897 = vmatpush3.bf16.msra.mxu1 %v2894_v28  ;;  %2927 = vmatprep.subr.bf16.mxu0 %v2926_v20  ;;  %v205_v28 = vrot.slane %v3770_v56, %v204_v27  ;;  %v579_v27 = vld [vmem:[#allocation7 + $0x28] sm:$0xff] }
  0x80   :  { %2931 = vmatprep.subr.bf16.mxu1 %v2930_v36 }
  0x82   :  { %2929 = vmatpush3.bf16.msra.mxu0 %v2926_v20  ;;  %v3813_v20 = vpack.c.bf16 %v710_v19, %v709_v18  ;;  %v712_v18 = vld [vmem:[#allocation7 + $0x108] sm:$0xff]  ;;  %v714_v19 = vld [vmem:[#allocation7 + $0x118] sm:$0xff] }
  0x83   :  { %2963 = vmatprep.subr.bf16.mxu0 %v2962_v26 }
 0x135   :  { %v2478_v58 = vpop.f32.mrb[0].mxu1 }
 0x136   :  { %v181_v59 = vadd.f32 %v2478_v58, %v101_v57  ;;  %v175_v60 = vpop.f32.mrb[1].mxu1 }
 0x137   :  { %v176_v61 = vadd.f32 %v175_v60, %v101_v57  ;;  %v492_v57 = vld [vmem:[#allocation5 + $0x208] sm:$0xff]  ;;  %v696_v60 = vld [vmem:[#allocation5 + $0x218] sm:$0xff] }
 0x138   :  { %v3777_v1 = vmax.f32 %v181_v59, 0.0  ;;  %v2990_v58 = vpack.c.bf16 %v492_v57, %v491_v53  ;;  %v695_v59 = vld [vmem:[#allocation5 + $0x210] sm:$0xff]  ;;  %v3014_v53 = vpack.c.bf16 %v597_v51, %v595_v50  ;;  %v725_v51 = vld [vmem:[#allocation7 + $0x170] sm:$0xff] }
 0x139   :  { %v3775_v0 = vmax.f32 %v176_v61, 0.0  ;;  %v3784_v61 = vpack.c.bf16 %v696_v60, %v695_v59  ;;  %v594_v57 = vld [vmem:[#allocation7 + $0xa0] sm:$0xff]  ;;  %v599_v59 = vld [vmem:[#allocation7 + $0xc8] sm:$0xff]  ;;  %v601_v60 = vld [vmem:[#allocation7 + $0xd8] sm:$0xff] }
 0x13a   :  { %v723_v50 = vld [vmem:[#allocation7 + $0x160] sm:$0xff] }
 0x13b   :  { %2511 = vmatprep.mubr.f32.mxu1 %v3775_v0 }
 0x13c   :  { %2512 = vmatmul.mubr.f32.vlgmr.msra.gmra.mrb[2].mxu1 %v3777_v1 }
 0x13d   :  { %2933 = vmatpush3.bf16.msra.mxu1 %v2930_v36 }
 0x13e   :  { %2935 = vmatprep.subr.bf16.mxu1 %v2934_v2 }
 0x141   :  { %2937 = vmatpush3.bf16.msra.mxu1 %v2934_v2  ;;  %v3787_v2 = vpack.c.bf16 %v698_v63, %v697_v62  ;;  %v3018_v63 = vpack.c.bf16 %v601_v60, %v599_v59  ;;  %v727_v59 = vld [vmem:[#allocation7 + $0x180] sm:$0xff]  ;;  %v729_v60 = vld [vmem:[#allocation7 + $0x190] sm:$0xff] }
 0x142   :  { %2939 = vmatprep.subr.bf16.mxu1 %v2938_v5 }
 0x145   :  { %2941 = vmatpush3.bf16.msra.mxu1 %v2938_v5  ;;  %v3792_v5 = vpack.c.bf16 %v700_v4, %v699_v3  ;;  %v598_v3 = vld [vmem:[#allocation7 + $0xc0] sm:$0xff]  ;;  %v600_v4 = vld [vmem:[#allocation7 + $0xd0] sm:$0xff] }
 0x146   :  { %2943 = vmatprep.subr.bf16.mxu1 %v2942_v8 }
 0x149   :  { %2945 = vmatpush3.bf16.msra.mxu1 %v2942_v8  ;;  %v3796_v8 = vpack.c.bf16 %v702_v7, %v701_v6  ;;  %v3020_v6 = vpack.c.bf16 %v600_v4, %v598_v3  ;;  %v603_v7 = vld [vmem:[#allocation7 + $0xe8] sm:$0xff]  ;;  %v3108_v3 = vpack.c.bf16 %v729_v60, %v727_v59  ;;  %v758_v60 = vld [vmem:[#allocation7 + $0x278] sm:$0xff] }
 0x14a   :  { %2947 = vmatprep.subr.bf16.mxu1 %v2946_v11  ;;  %v756_v59 = vld [vmem:[#allocation7 + $0x268] sm:$0xff] }
 0x14d   :  { %2949 = vmatpush3.bf16.msra.mxu1 %v2946_v11  ;;  %v3800_v11 = vpack.c.bf16 %v704_v10, %v703_v9  ;;  %v605_v9 = vld [vmem:[#allocation7 + $0xf8] sm:$0xff] }
 0x14e   :  { %2951 = vmatprep.subr.bf16.mxu1 %v2950_v14  ;;  %v3022_v10 = vpack.c.bf16 %v605_v9, %v603_v7  ;;  %v733_v7 = vld [vmem:[#allocation7 + $0x1b0] sm:$0xff]  ;;  %v736_v9 = vld [vmem:[#allocation7 + $0x1c8] sm:$0xff] }
 0x151   :  { %2953 = vmatpush3.bf16.msra.mxu1 %v2950_v14  ;;  %v3804_v14 = vpack.c.bf16 %v706_v13, %v705_v12  ;;  %v602_v12 = vld [vmem:[#allocation7 + $0xe0] sm:$0xff]  ;;  %v604_v13 = vld [vmem:[#allocation7 + $0xf0] sm:$0xff] }
 0x152   :  { %2955 = vmatprep.subr.bf16.mxu1 %v2954_v17 }
 0x155   :  { %2957 = vmatpush3.bf16.msra.mxu1 %v2954_v17  ;;  %v3808_v17 = vpack.c.bf16 %v708_v16, %v707_v15  ;;  %v3024_v15 = vpack.c.bf16 %v604_v13, %v602_v12  ;;  %v3645_v16 = vmov 0.0  }
 0x156   :  { %2959 = vmatprep.subr.bf16.mxu1 %v2958_v23 }
 0x159   :  { %2961 = vmatpush3.bf16.msra.mxu1 %v2958_v23  ;;  %v2994_v23 = vpack.c.bf16 %v577_v22, %v575_v21  ;;  %v3090_v21 = vpack.c.bf16 %v714_v19, %v712_v18  ;;  %v301_v22 = vsub.s32 2, %v3767_v54  ;;  %v737_v18 = vld [vmem:[#allocation7 + $0x1d0] sm:$0xff]  ;;  %v495_v19 = vsub.s32 4, %v3767_v54 }
 0x15b   :  { %2995 = vmatprep.subr.bf16.mxu1 %v2994_v23  ;;  %v302_v23 = vrot.slane %v3770_v56, %v301_v22  ;;  %v398_v22 = vsub.s32 3, %v3767_v54 }
 0x20f   :  { %v2513_v29 = vpop.f32.mrb[2].mxu1 }
 0x210   :  { %v278_v30 = vadd.f32 %v2513_v29, %v205_v28  ;;  %v272_v31 = vpop.f32.mrb[3].mxu1 }
 0x211   :  { %v273_v32 = vadd.f32 %v272_v31, %v205_v28  ;;  %v581_v28 = vld [vmem:[#allocation7 + $0x38] sm:$0xff]  ;;  %v580_v31 = vld [vmem:[#allocation7 + $0x30] sm:$0xff] }
 0x212   :  { %v282_v36 = vmax.f32 %v278_v30, 0.0  ;;  %v2998_v29 = vpack.c.bf16 %v581_v28, %v579_v27  ;;  %v578_v30 = vld [vmem:[#allocation7 + $0x20] sm:$0xff] }
 0x213   :  { %v281_v35 = vmax.f32 %v273_v32, 0.0  ;;  %v583_v32 = vld [vmem:[#allocation7 + $0x48] sm:$0xff]  ;;  %v3000_v33 = vpack.c.bf16 %v580_v31, %v578_v30  ;;  %v713_v30 = vld [vmem:[#allocation7 + $0x110] sm:$0xff] }
 0x215   :  { %2546 = vmatprep.mubr.f32.mxu0 %v281_v35  ;;  %2581 = vmatprep.mubr.f32.mxu1 %v281_v35  ;;  %v582_v35 = vld [vmem:[#allocation7 + $0x40] sm:$0xff] }
 0x216   :  { %2547 = vmatmul.mubr.f32.vlgmr.msra.gmra.mrb[0].mxu0 %v282_v36  ;;  %2582 = vmatmul.mubr.f32.vlgmr.msra.gmra.mrb[4].mxu1 %v282_v36  ;;  %v584_v36 = vld [vmem:[#allocation7 + $0x50] sm:$0xff] }
 0x217   :  { %2965 = vmatpush3.bf16.msra.mxu0 %v2962_v26  ;;  %2616 = vmatprep.mubr.f32.mxu0 %v3775_v0  ;;  %v2996_v26 = vpack.c.bf16 %v576_v25, %v574_v24 }
 0x218   :  { %2967 = vmatprep.subr.bf16.mxu0 %v2966_v37  ;;  %678 = vmatprep.mubr.f32.mxu1 %v3645_v16 }
 0x219   :  { %2997 = vmatpush1.bf16.msra.mxu1 %v2996_v26 }
 0x21a   :  { %2999 = vmatprep.subr.bf16.mxu1 %v2998_v29  ;;  %v711_v29 = vld [vmem:[#allocation7 + $0x100] sm:$0xff] }
 0x21b   :  { %2969 = vmatpush3.bf16.msra.mxu0 %v2966_v37  ;;  %v3002_v37 = vpack.c.bf16 %v585_v34, %v583_v32  ;;  %v716_v32 = vld [vmem:[#allocation7 + $0x128] sm:$0xff] }
 0x21c   :  { %2971 = vmatprep.subr.bf16.mxu0 %v2970_v40 }
 0x21d   :  { %3001 = vmatpush1.bf16.msra.mxu1 %v3000_v33  ;;  %v718_v33 = vld [vmem:[#allocation7 + $0x138] sm:$0xff] }
 0x21e   :  { %3003 = vmatprep.subr.bf16.mxu1 %v3002_v37  ;;  %v3094_v37 = vpack.c.bf16 %v718_v33, %v716_v32 }
 0x21f   :  { %2973 = vmatpush3.bf16.msra.mxu0 %v2970_v40  ;;  %v3004_v40 = vpack.c.bf16 %v584_v36, %v582_v35  ;;  %v3092_v35 = vpack.c.bf16 %v713_v30, %v711_v29 }
 0x220   :  { %2975 = vmatprep.subr.bf16.mxu0 %v2974_v43 }
 0x221   :  { %3005 = vmatpush1.bf16.msra.mxu1 %v3004_v40  ;;  %v720_v40 = vld [vmem:[#allocation7 + $0x148] sm:$0xff] }
 0x222   :  { %3007 = vmatprep.subr.bf16.mxu1 %v3006_v41  ;;  %v722_v41 = vld [vmem:[#allocation7 + $0x158] sm:$0xff] }
 0x223   :  { %2977 = vmatpush3.bf16.msra.mxu0 %v2974_v43  ;;  %v588_v43 = vld [vmem:[#allocation7 + $0x70] sm:$0xff] }
 0x224   :  { %2979 = vmatprep.subr.bf16.mxu0 %v2978_v46 }
 0x227   :  { %2981 = vmatpush3.bf16.msra.mxu0 %v2978_v46  ;;  %v3008_v46 = vpack.c.bf16 %v588_v43, %v586_v42  ;;  %v3096_v42 = vpack.c.bf16 %v717_v39, %v715_v38  ;;  %v3098_v43 = vpack.c.bf16 %v722_v41, %v720_v40  ;;  %v741_v41 = vld [vmem:[#allocation7 + $0x1f0] sm:$0xff] }
 0x228   :  { %2983 = vmatprep.subr.bf16.mxu0 %v2982_v49 }
 0x229   :  { %3009 = vmatpush1.bf16.msra.mxu1 %v3008_v46  ;;  %v724_v46 = vld [vmem:[#allocation7 + $0x168] sm:$0xff] }
 0x22a   :  { %3011 = vmatprep.subr.bf16.mxu1 %v3010_v47  ;;  %v726_v47 = vld [vmem:[#allocation7 + $0x178] sm:$0xff] }
 0x22b   :  { %2985 = vmatpush3.bf16.msra.mxu0 %v2982_v49  ;;  %v592_v49 = vld [vmem:[#allocation7 + $0x90] sm:$0xff] }
 0x22c   :  { %2987 = vmatprep.subr.bf16.mxu0 %v2986_v52 }
 0x22f   :  { %2989 = vmatpush3.bf16.msra.mxu0 %v2986_v52  ;;  %v3012_v52 = vpack.c.bf16 %v592_v49, %v590_v48  ;;  %v3100_v48 = vpack.c.bf16 %v721_v45, %v719_v44  ;;  %v3102_v49 = vpack.c.bf16 %v726_v47, %v724_v46  ;;  %v743_v44 = vld [vmem:[#allocation7 + $0x200] sm:$0xff]  ;;  %v745_v45 = vld [vmem:[#allocation7 + $0x210] sm:$0xff]  ;;  %v748_v46 = vld [vmem:[#allocation7 + $0x228] sm:$0xff] }
 0x230   :  { %2991 = vmatprep.subr.bf16.mxu0 %v2990_v58  ;;  %v3124_v47 = vpack.c.bf16 %v745_v45, %v743_v44  ;;  %v1106_v44 = vld [vmem:[#allocation5 + $0x328] sm:$0xff]  ;;  %v1107_v45 = vld [vmem:[#allocation5 + $0x330] sm:$0xff] }
 0x231   :  { %3013 = vmatpush1.bf16.msra.mxu1 %v3012_v52  ;;  %v728_v52 = vld [vmem:[#allocation7 + $0x188] sm:$0xff] }
 0x232   :  { %3015 = vmatprep.subr.bf16.mxu1 %v3014_v53  ;;  %v730_v53 = vld [vmem:[#allocation7 + $0x198] sm:$0xff] }
 0x233   :  { %2993 = vmatpush3.bf16.msra.mxu0 %v2990_v58  ;;  %v596_v58 = vld [vmem:[#allocation7 + $0xb0] sm:$0xff] }
 0x234   :  { %3027 = vmatprep.subr.bf16.mxu0 %v3784_v61  ;;  %v3016_v62 = vpack.c.bf16 %v596_v58, %v594_v57  ;;  %v3104_v57 = vpack.c.bf16 %v725_v51, %v723_v50  ;;  %v3106_v58 = vpack.c.bf16 %v730_v53, %v728_v52  ;;  %v752_v50 = vld [vmem:[#allocation7 + $0x248] sm:$0xff]  ;;  %v754_v51 = vld [vmem:[#allocation7 + $0x258] sm:$0xff] }
 0x235   :  { %v3130_v53 = vpack.c.bf16 %v754_v51, %v752_v50  ;;  %v1112_v50 = vld [vmem:[#allocation5 + $0x358] sm:$0xff] }
 0x236   :  { %2617 = vmatmul.mubr.f32.vlgmr.msra.gmra.mrb[2].mxu0 %v3777_v1  ;;  %3017 = vmatpush1.bf16.msra.mxu1 %v3016_v62  ;;  %v732_v62 = vld [vmem:[#allocation7 + $0x1a8] sm:$0xff] }
 0x237   :  { %3029 = vmatpush3.bf16.msra.mxu0 %v3784_v61  ;;  %3019 = vmatprep.subr.bf16.mxu1 %v3018_v63  ;;  %v734_v63 = vld [vmem:[#allocation7 + $0x1b8] sm:$0xff] }
 0x238   :  { %3031 = vmatprep.subr.bf16.mxu0 %v3787_v2  ;;  %v3110_v4 = vpack.c.bf16 %v734_v63, %v732_v62  ;;  %v3134_v62 = vpack.c.bf16 %v758_v60, %v756_v59  ;;  %v755_v63 = vld [vmem:[#allocation7 + $0x260] sm:$0xff]  ;;  %v1116_v59 = vld [vmem:[#allocation5 + $0x378] sm:$0xff] }
 0x23a   :  { %3021 = vmatpush1.bf16.msra.mxu1 %v3020_v6  ;;  %v731_v6 = vld [vmem:[#allocation7 + $0x1a0] sm:$0xff] }
 0x23b   :  { %3033 = vmatpush3.bf16.msra.mxu0 %v3787_v2  ;;  %3023 = vmatprep.subr.bf16.mxu1 %v3022_v10  ;;  %v738_v10 = vld [vmem:[#allocation7 + $0x1d8] sm:$0xff]  ;;  %v3112_v12 = vpack.c.bf16 %v733_v7, %v731_v6 }
 0x23c   :  { %3035 = vmatprep.subr.bf16.mxu0 %v3792_v5  ;;  %v3114_v13 = vpack.c.bf16 %v738_v10, %v736_v9  ;;  %v762_v6 = vld [vmem:[#allocation7 + $0x298] sm:$0xff]  ;;  %v759_v9 = vld [vmem:[#allocation7 + $0x280] sm:$0xff]  ;;  %v761_v10 = vld [vmem:[#allocation7 + $0x290] sm:$0xff] }
 0x23e   :  { %3025 = vmatpush1.bf16.msra.mxu1 %v3024_v15  ;;  %v735_v15 = vld [vmem:[#allocation7 + $0x1c0] sm:$0xff] }
 0x23f   :  { %3037 = vmatpush3.bf16.msra.mxu0 %v3792_v5  ;;  %3059 = vmatprep.subr.bf16.mxu1 %v3784_v61 }
 0x240   :  { %3039 = vmatprep.subr.bf16.mxu0 %v3796_v8 }
 0x243   :  { %3041 = vmatpush3.bf16.msra.mxu0 %v3796_v8 }
 0x244   :  { %3043 = vmatprep.subr.bf16.mxu0 %v3800_v11 }
 0x247   :  { %3045 = vmatpush3.bf16.msra.mxu0 %v3800_v11 }
 0x248   :  { %3047 = vmatprep.subr.bf16.mxu0 %v3804_v14 }
 0x24b   :  { %3049 = vmatpush3.bf16.msra.mxu0 %v3804_v14 }
 0x24c   :  { %3051 = vmatprep.subr.bf16.mxu0 %v3808_v17 }
 0x24f   :  { %3053 = vmatpush3.bf16.msra.mxu0 %v3808_v17 }
 0x250   :  { %3055 = vmatprep.subr.bf16.mxu0 %v3813_v20 }
 0x253   :  { %3057 = vmatpush3.bf16.msra.mxu0 %v3813_v20 }
 0x254   :  { %3091 = vmatprep.subr.bf16.mxu0 %v3090_v21  ;;  %v3116_v21 = vpack.c.bf16 %v737_v18, %v735_v15  ;;  %v3140_v15 = vpack.c.bf16 %v761_v10, %v759_v9 }
 0x2e9   :  { %v2548_v24 = vpop.f32.mrb[0].mxu0  ;;  %v3821_v25 = vpop.f32.mrb[4].mxu1 }
 0x2ea   :  { %v3823_v26 = vadd.f32 %v2548_v24, %v302_v23  ;;  %v369_v27 = vpop.f32.mrb[1].mxu0  ;;  %v3825_v28 = vpop.f32.mrb[5].mxu1 }
 0x2eb   :  { %v3827_v31 = vadd.f32 %v369_v27, %v302_v23  ;;  %v496_v23 = vrot.slane %v3770_v56, %v495_v19  ;;  %v399_v27 = vrot.slane %v3770_v56, %v398_v22  ;;  %v763_v19 = vld [vmem:[#allocation7 + $0x2a0] sm:$0xff]  ;;  %v768_v22 = vld [vmem:[#allocation7 + $0x2c8] sm:$0xff] }
 0x2ec   :  { %v379_v36 = vmax.f32 %v3823_v26, 0.0  ;;  %v1392_v26 = vld [vmem:[#allocation8 + $0x30] sm:$0xff] }
 0x2ed   :  { %v378_v34 = vmax.f32 %v3827_v31, 0.0 }
 0x2ef   :  { %2651 = vmatprep.mubr.f32.mxu0 %v378_v34 }
 0x2f0   :  { %2652 = vmatmul.mubr.f32.vlgmr.msra.gmra.mrb[4].mxu0 %v379_v36 }
 0x2f1   :  { %3093 = vmatpush1.bf16.msra.mxu0 %v3092_v35  ;;  %v3840_v35 = vadd.f32 %v3825_v28, %v399_v27  ;;  %v3860_v28 = vadd.f32 %v3821_v25, %v399_v27  ;;  %v742_v25 = vld [vmem:[#allocation7 + $0x1f8] sm:$0xff] }
 0x2f2   :  { %3095 = vmatprep.subr.bf16.mxu0 %v3094_v37 }
 0x2f3   :  { %v475_v38 = vmax.f32 %v3840_v35, 0.0  ;;  %v476_v39 = vmax.f32 %v3860_v28, 0.0  ;;  %v1094_v35 = vld [vmem:[#allocation5 + $0x2c8] sm:$0xff]  ;;  %v1095_v28 = vld [vmem:[#allocation5 + $0x2d0] sm:$0xff] }
 0x2f5   :  { %3097 = vmatpush1.bf16.msra.mxu0 %v3096_v42  ;;  %v744_v42 = vld [vmem:[#allocation7 + $0x208] sm:$0xff] }
 0x2f6   :  { %3099 = vmatprep.subr.bf16.mxu0 %v3098_v43  ;;  %v746_v43 = vld [vmem:[#allocation7 + $0x218] sm:$0xff] }
 0x2f9   :  { %3101 = vmatpush1.bf16.msra.mxu0 %v3100_v48  ;;  %v747_v48 = vld [vmem:[#allocation7 + $0x220] sm:$0xff] }
 0x2fa   :  { %3103 = vmatprep.subr.bf16.mxu0 %v3102_v49  ;;  %v749_v49 = vld [vmem:[#allocation7 + $0x230] sm:$0xff] }
 0x2fb   :  { %v3128_v52 = vpack.c.bf16 %v749_v49, %v747_v48  ;;  %v1111_v49 = vld [vmem:[#allocation5 + $0x350] sm:$0xff] }
 0x2fc   :  { %v3202_v51 = vpack.c.bf16 %v1112_v50, %v1111_v49  ;;  %v1292_v49 = vld [vmem:[#allocation5 + $0x448] sm:$0xff] }
 0x2fd   :  { %3105 = vmatpush1.bf16.msra.mxu0 %v3104_v57  ;;  %v751_v57 = vld [vmem:[#allocation7 + $0x240] sm:$0xff] }
 0x2fe   :  { %3107 = vmatprep.subr.bf16.mxu0 %v3106_v58  ;;  %v753_v58 = vld [vmem:[#allocation7 + $0x250] sm:$0xff] }
 0x301   :  { %3109 = vmatpush1.bf16.msra.mxu0 %v3108_v3  ;;  %v757_v3 = vld [vmem:[#allocation7 + $0x270] sm:$0xff] }
 0x302   :  { %3111 = vmatprep.subr.bf16.mxu0 %v3110_v4  ;;  %v760_v4 = vld [vmem:[#allocation7 + $0x288] sm:$0xff]  ;;  %v3136_v7 = vpack.c.bf16 %v757_v3, %v755_v63  ;;  %v1087_v3 = vld [vmem:[#allocation5 + $0x290] sm:$0xff] }
 0x305   :  { %3113 = vmatpush1.bf16.msra.mxu0 %v3112_v12  ;;  %v764_v12 = vld [vmem:[#allocation7 + $0x2a8] sm:$0xff] }
 0x306   :  { %3115 = vmatprep.subr.bf16.mxu0 %v3114_v13  ;;  %v766_v13 = vld [vmem:[#allocation7 + $0x2b8] sm:$0xff] }
 0x307   :  { %v3142_v18 = vpack.c.bf16 %v766_v13, %v764_v12  ;;  %v608_v13 = vsub.s32 5, %v3767_v54 }
 0x309   :  { %v2618_v24 = vpop.f32.mrb[2].mxu0  ;;  %3117 = vmatpush1.bf16.msra.mxu0 %v3116_v21  ;;  %v765_v21 = vld [vmem:[#allocation7 + $0x2b0] sm:$0xff] }
 0x30a   :  { %v563_v29 = vpop.f32.mrb[3].mxu0  ;;  %v569_v32 = vadd.f32 %v2618_v24, %v496_v23  ;;  %v3144_v24 = vpack.c.bf16 %v765_v21, %v763_v19 }
 0x30b   :  { %v564_v30 = vadd.f32 %v563_v29, %v496_v23  ;;  %v770_v23 = vld [vmem:[#allocation7 + $0x2d8] sm:$0xff]  ;;  %v767_v29 = vld [vmem:[#allocation7 + $0x2c0] sm:$0xff] }
 0x30c   :  { %v573_v37 = vmax.f32 %v569_v32, 0.0  ;;  %v3146_v27 = vpack.c.bf16 %v770_v23, %v768_v22 }
 0x30d   :  { %v572_v33 = vmax.f32 %v564_v30, 0.0  ;;  %v769_v30 = vld [vmem:[#allocation7 + $0x2d0] sm:$0xff] }
 0x30e   :  { %v3148_v32 = vpack.c.bf16 %v769_v30, %v767_v29  ;;  %v1287_v30 = vld [vmem:[#allocation5 + $0x420] sm:$0xff] }
 0x30f   :  { %679 = vmatmul.mubr.f32.vlgmr.msra.gmra.mrb[6].mxu1 %v572_v33  ;;  %v772_v33 = vld [vmem:[#allocation7 + $0x2e8] sm:$0xff] }
 0x310   :  { %3061 = vmatpush3.bf16.msra.mxu1 %v3784_v61  ;;  %684 = vmatprep.mubr.f32.mxu1 %v3645_v16 }
 0x311   :  { %3063 = vmatprep.subr.bf16.mxu1 %v3787_v2 }
 0x313   :  { %685 = vmatmul.mubr.f32.gmra.mrb[8].mxu1 %v573_v37  ;;  %v774_v37 = vld [vmem:[#allocation7 + $0x2f8] sm:$0xff] }
 0x314   :  { %3065 = vmatpush3.bf16.msra.mxu1 %v3787_v2  ;;  %2686 = vmatprep.mubr.f32.mxu1 %v475_v38 }
 0x315   :  { %3067 = vmatprep.subr.bf16.mxu1 %v3792_v5 }
 0x318   :  { %3069 = vmatpush3.bf16.msra.mxu1 %v3792_v5 }
 0x319   :  { %3071 = vmatprep.subr.bf16.mxu1 %v3796_v8 }
 0x31c   :  { %3073 = vmatpush3.bf16.msra.mxu1 %v3796_v8 }
 0x31d   :  { %3075 = vmatprep.subr.bf16.mxu1 %v3800_v11 }
 0x320   :  { %3077 = vmatpush3.bf16.msra.mxu1 %v3800_v11 }
 0x321   :  { %3079 = vmatprep.subr.bf16.mxu1 %v3804_v14 }
 0x324   :  { %3081 = vmatpush3.bf16.msra.mxu1 %v3804_v14 }
 0x325   :  { %3083 = vmatprep.subr.bf16.mxu1 %v3808_v17 }
 0x328   :  { %3085 = vmatpush3.bf16.msra.mxu1 %v3808_v17 }
 0x329   :  { %3087 = vmatprep.subr.bf16.mxu1 %v3813_v20 }
 0x32c   :  { %3089 = vmatpush3.bf16.msra.mxu1 %v3813_v20 }
 0x32d   :  { %3155 = vmatprep.subr.bf16.mxu1 %v3784_v61 }
 0x32f   :  { %2687 = vmatmul.mubr.f32.vlgmr.msra.gmra.mrb[10].mxu1 %v476_v39 }
 0x330   :  { %3157 = vmatpush3.bf16.msra.mxu1 %v3784_v61  ;;  %2721 = vmatprep.mubr.f32.mxu1 %v3775_v0  ;;  %v740_v61 = vld [vmem:[#allocation7 + $0x1e8] sm:$0xff] }
 0x331   :  { %3159 = vmatprep.subr.bf16.mxu1 %v3787_v2  ;;  %v3118_v40 = vpack.c.bf16 %v742_v25, %v740_v61  ;;  %v1103_v61 = vld [vmem:[#allocation5 + $0x310] sm:$0xff]  ;;  %v3150_v25 = vpack.c.bf16 %v774_v37, %v772_v33 }
 0x333   :  { %3119 = vmatprep.subr.bf16.mxu0 %v3118_v40  ;;  %v1104_v40 = vld [vmem:[#allocation5 + $0x318] sm:$0xff] }
 0x334   :  { %3161 = vmatpush3.bf16.msra.mxu1 %v3787_v2  ;;  %v739_v2 = vld [vmem:[#allocation7 + $0x1e0] sm:$0xff] }
 0x335   :  { %3163 = vmatprep.subr.bf16.mxu1 %v3792_v5 }
 0x338   :  { %3165 = vmatpush3.bf16.msra.mxu1 %v3792_v5  ;;  %v3120_v5 = vpack.c.bf16 %v741_v41, %v739_v2  ;;  %v771_v2 = vld [vmem:[#allocation7 + $0x2e0] sm:$0xff]  ;;  %v773_v41 = vld [vmem:[#allocation7 + $0x2f0] sm:$0xff] }
 0x339   :  { %3167 = vmatprep.subr.bf16.mxu1 %v3796_v8 }
 0x33a   :  { %3121 = vmatpush1.bf16.msra.mxu0 %v3120_v5  ;;  %v3186_v5 = vpack.c.bf16 %v1104_v40, %v1103_v61 }
 0x33c   :  { %3169 = vmatpush3.bf16.msra.mxu1 %v3796_v8  ;;  %v3122_v8 = vpack.c.bf16 %v746_v43, %v744_v42  ;;  %v3152_v42 = vpack.c.bf16 %v773_v41, %v771_v2  ;;  %v1105_v43 = vld [vmem:[#allocation5 + $0x320] sm:$0xff] }
 0x33d   :  { %3171 = vmatprep.subr.bf16.mxu1 %v3800_v11  ;;  %v1271_v41 = vld [vmem:[#allocation5 + $0x3a0] sm:$0xff] }
 0x33e   :  { %3123 = vmatprep.subr.bf16.mxu0 %v3122_v8  ;;  %v3190_v8 = vpack.c.bf16 %v1106_v44, %v1105_v43  ;;  %v1289_v43 = vld [vmem:[#allocation5 + $0x430] sm:$0xff]  ;;  %v1290_v44 = vld [vmem:[#allocation5 + $0x438] sm:$0xff] }
 0x33f   :  { %3125 = vmatpush1.bf16.msra.mxu0 %v3124_v47  ;;  %v1109_v47 = vld [vmem:[#allocation5 + $0x340] sm:$0xff] }
 0x340   :  { %3173 = vmatpush3.bf16.msra.mxu1 %v3800_v11  ;;  %v750_v11 = vld [vmem:[#allocation7 + $0x238] sm:$0xff] }
 0x341   :  { %3175 = vmatprep.subr.bf16.mxu1 %v3804_v14 }
 0x344   :  { %3177 = vmatpush3.bf16.msra.mxu1 %v3804_v14  ;;  %v3126_v14 = vpack.c.bf16 %v750_v11, %v748_v46  ;;  %v1108_v46 = vld [vmem:[#allocation5 + $0x338] sm:$0xff] }
 0x345   :  { %3179 = vmatprep.subr.bf16.mxu1 %v3808_v17  ;;  %v3194_v11 = vpack.c.bf16 %v1108_v46, %v1107_v45 }
 0x346   :  { %3127 = vmatprep.subr.bf16.mxu0 %v3126_v14  ;;  %v1110_v14 = vld [vmem:[#allocation5 + $0x348] sm:$0xff] }
 0x347   :  { %3129 = vmatpush1.bf16.msra.mxu0 %v3128_v52  ;;  %v3198_v48 = vpack.c.bf16 %v1110_v14, %v1109_v47  ;;  %v1113_v52 = vld [vmem:[#allocation5 + $0x360] sm:$0xff]  ;;  %v1273_v47 = vld [vmem:[#allocation5 + $0x3b0] sm:$0xff]  ;;  %v1274_v14 = vld [vmem:[#allocation5 + $0x3b8] sm:$0xff] }
 0x348   :  { %3181 = vmatpush3.bf16.msra.mxu1 %v3808_v17  ;;  %v3132_v17 = vpack.c.bf16 %v753_v58, %v751_v57  ;;  %3131 = vmatprep.subr.bf16.mxu0 %v3130_v53  ;;  %v1114_v53 = vld [vmem:[#allocation5 + $0x368] sm:$0xff]  ;;  %v1115_v58 = vld [vmem:[#allocation5 + $0x370] sm:$0xff]  ;;  %v3260_v50 = vpack.c.bf16 %v1274_v14, %v1273_v47 }
 0x349   :  { %3183 = vmatprep.subr.bf16.mxu1 %v3813_v20  ;;  %v3206_v57 = vpack.c.bf16 %v1114_v53, %v1113_v52  ;;  %v3210_v60 = vpack.c.bf16 %v1116_v59, %v1115_v58  ;;  %v1275_v52 = vld [vmem:[#allocation5 + $0x3c0] sm:$0xff]  ;;  %v1276_v53 = vld [vmem:[#allocation5 + $0x3c8] sm:$0xff]  ;;  %v1294_v58 = vld [vmem:[#allocation5 + $0x458] sm:$0xff] }
 0x34a   :  { %v3264_v59 = vpack.c.bf16 %v1276_v53, %v1275_v52  ;;  %v1099_v14 = vld [vmem:[#allocation5 + $0x2f0] sm:$0xff] }
 0x34b   :  { %3133 = vmatpush1.bf16.msra.mxu0 %v3132_v17  ;;  %v1117_v17 = vld [vmem:[#allocation5 + $0x380] sm:$0xff] }
 0x34c   :  { %3185 = vmatpush3.bf16.msra.mxu1 %v3813_v20  ;;  %3135 = vmatprep.subr.bf16.mxu0 %v3134_v62  ;;  %v3138_v20 = vpack.c.bf16 %v762_v6, %v760_v4  ;;  %v1118_v62 = vld [vmem:[#allocation5 + $0x388] sm:$0xff]  ;;  %v1088_v4 = vld [vmem:[#allocation5 + $0x298] sm:$0xff] }
 0x34d   :  { %3187 = vmatprep.subr.bf16.mxu1 %v3186_v5  ;;  %v3214_v63 = vpack.c.bf16 %v1118_v62, %v1117_v17  ;;  %v3885_v6 = vpack.c.bf16 %v1088_v4, %v1087_v3  ;;  %v1277_v17 = vld [vmem:[#allocation5 + $0x3d0] sm:$0xff]  ;;  %v1278_v62 = vld [vmem:[#allocation5 + $0x3d8] sm:$0xff]  ;;  %v1296_v3 = vld [vmem:[#allocation5 + $0x468] sm:$0xff] }
 0x34e   :  { %v3268_v4 = vpack.c.bf16 %v1278_v62, %v1277_v17  ;;  %v1283_v17 = vld [vmem:[#allocation5 + $0x400] sm:$0xff]  ;;  %v1284_v62 = vld [vmem:[#allocation5 + $0x408] sm:$0xff] }
 0x34f   :  { %2722 = vmatmul.mubr.f32.vlgmr.msra.gmra.mrb[12].mxu1 %v3777_v1  ;;  %3137 = vmatpush1.bf16.msra.mxu0 %v3136_v7  ;;  %v1285_v7 = vld [vmem:[#allocation5 + $0x410] sm:$0xff] }
 0x350   :  { %3139 = vmatprep.subr.bf16.mxu0 %v3138_v20  ;;  %3189 = vmatpush3.bf16.msra.mxu1 %v3186_v5  ;;  %v1286_v20 = vld [vmem:[#allocation5 + $0x418] sm:$0xff]  ;;  %v1272_v5 = vld [vmem:[#allocation5 + $0x3a8] sm:$0xff] }
 0x351   :  { %3191 = vmatprep.subr.bf16.mxu1 %v3190_v8  ;;  %v3250_v9 = vpack.c.bf16 %v1286_v20, %v1285_v7  ;;  %v3256_v45 = vpack.c.bf16 %v1272_v5, %v1271_v41  ;;  %v1279_v20 = vld [vmem:[#allocation5 + $0x3e0] sm:$0xff] }
 0x353   :  { %3141 = vmatpush1.bf16.msra.mxu0 %v3140_v15  ;;  %v3893_v15 = vld [vmem:[#allocation10 + $0x8] sm:$0xff] }
 0x354   :  { %3143 = vmatprep.subr.bf16.mxu0 %v3142_v18  ;;  %3193 = vmatpush3.bf16.msra.mxu1 %v3190_v8  ;;  %v609_v18 = vrot.slane %v3770_v56, %v608_v13  ;;  %v613_v19 = vrot.slane %v3893_v15, %v608_v13  ;;  %v1297_v13 = vld [vmem:[#allocation5 + $0x470] sm:$0xff] }
 0x355   :  { %3195 = vmatprep.subr.bf16.mxu1 %v3194_v11 }
 0x357   :  { %3145 = vmatpush1.bf16.msra.mxu0 %v3144_v24  ;;  %v1269_v24 = vld [vmem:[#allocation5 + $0x390] sm:$0xff] }
 0x358   :  { %3147 = vmatprep.subr.bf16.mxu0 %v3146_v27  ;;  %3197 = vmatpush3.bf16.msra.mxu1 %v3194_v11  ;;  %v1270_v27 = vld [vmem:[#allocation5 + $0x398] sm:$0xff]  ;;  %v3258_v11 = vpack.c.bf16 %v1290_v44, %v1289_v43  ;;  %v1091_v43 = vld [vmem:[#allocation5 + $0x2b0] sm:$0xff] }
 0x359   :  { %3199 = vmatprep.subr.bf16.mxu1 %v3198_v48  ;;  %v3252_v61 = vpack.c.bf16 %v1270_v27, %v1269_v24  ;;  %v1282_v24 = vld [vmem:[#allocation5 + $0x3f8] sm:$0xff] }
 0x35a   :  { %v1092_v44 = vld [vmem:[#allocation5 + $0x2b8] sm:$0xff] }
 0x35b   :  { %3149 = vmatpush1.bf16.msra.mxu0 %v3148_v32  ;;  %v1288_v32 = vld [vmem:[#allocation5 + $0x428] sm:$0xff] }
 0x35c   :  { %3151 = vmatprep.subr.bf16.mxu0 %v3150_v25  ;;  %3201 = vmatpush3.bf16.msra.mxu1 %v3198_v48  ;;  %v3254_v2 = vpack.c.bf16 %v1288_v32, %v1287_v30  ;;  %v1291_v48 = vld [vmem:[#allocation5 + $0x440] sm:$0xff] }
 0x35d   :  { %3203 = vmatprep.subr.bf16.mxu1 %v3202_v51  ;;  %v1089_v32 = vld [vmem:[#allocation5 + $0x2a0] sm:$0xff] }
 0x35f   :  { %3153 = vmatpush1.bf16.msra.mxu0 %v3152_v42 }
 0x360   :  { %3205 = vmatpush3.bf16.msra.mxu1 %v3202_v51  ;;  %3251 = vmatprep.subr.bf16.mxu0 %v3250_v9  ;;  %v3262_v51 = vpack.c.bf16 %v1292_v49, %v1291_v48  ;;  %v1280_v9 = vld [vmem:[#allocation5 + $0x3e8] sm:$0xff]  ;;  %v1101_v49 = vld [vmem:[#allocation5 + $0x300] sm:$0xff] }
 0x361   :  { %3207 = vmatprep.subr.bf16.mxu1 %v3206_v57 }
 0x364   :  { %3209 = vmatpush3.bf16.msra.mxu1 %v3206_v57  ;;  %v1293_v57 = vld [vmem:[#allocation5 + $0x450] sm:$0xff] }
 0x365   :  { %3211 = vmatprep.subr.bf16.mxu1 %v3210_v60 }
 0x368   :  { %3213 = vmatpush3.bf16.msra.mxu1 %v3210_v60  ;;  %v3266_v60 = vpack.c.bf16 %v1294_v58, %v1293_v57  ;;  %v1299_v58 = vld [vmem:[#allocation5 + $0x480] sm:$0xff] }
 0x369   :  { %3215 = vmatprep.subr.bf16.mxu1 %v3214_v63 }
 0x36c   :  { %3217 = vmatpush3.bf16.msra.mxu1 %v3214_v63  ;;  %v1295_v63 = vld [vmem:[#allocation5 + $0x460] sm:$0xff] }
 0x36d   :  { %3219 = vmatprep.subr.bf16.mxu1 %v3885_v6  ;;  %v3270_v7 = vpack.c.bf16 %v1296_v3, %v1295_v63  ;;  %v3280_v63 = vpack.c.bf16 %v1284_v62, %v1283_v17  ;;  %v1387_v3 = vld [vmem:[#allocation8 + $0x8] sm:$0xff] }
 0x3c3   :  { %v3888_v10 = vpop.f32.mrb[4].mxu0 }
 0x3c4   :  { %v3890_v12 = vpop.f32.mrb[5].mxu0  ;;  %v851_v57 = vmax.f32 %v379_v36, %v3888_v10  ;;  %v1397_v10 = vld [vmem:[#allocation8 + $0x58] sm:$0xff] }
 0x3c5   :  { %v850_v5 = vmax.f32 %v378_v34, %v3890_v12  ;;  %v1097_v34 = vld [vmem:[#allocation5 + $0x2e0] sm:$0xff]  ;;  %v1098_v12 = vld [vmem:[#allocation5 + $0x2e8] sm:$0xff] }
 0x3c6   :  { %v3238_v47 = vpack.c.bf16 %v1098_v12, %v1097_v34  ;;  %v1429_v34 = vld [vmem:[#allocation8 + $0x158] sm:$0xff] }
 0x3c7   :  { %v1433_v12 = vld [vmem:[#allocation8 + $0x178] sm:$0xff] }
 0x3e2   :  { %v680_v21 = vpop.f32.mrb[6].mxu1 }
 0x3e3   :  { %v3897_v22 = vadd.f32 %v680_v21, %v609_v18  ;;  %v682_v23 = vpop.f32.mrb[7].mxu1 }
 0x3e4   :  { %v3899_v29 = vadd.f32 %v682_v23, %v613_v19  ;;  %v1281_v23 = vld [vmem:[#allocation5 + $0x3f0] sm:$0xff] }
 0x3e5   :  { %v691_v25 = vmax.f32 %v3897_v22, 0.0  ;;  %v3276_v27 = vpack.c.bf16 %v1282_v24, %v1281_v23  ;;  %v1396_v23 = vld [vmem:[#allocation8 + $0x50] sm:$0xff] }
 0x3e6   :  { %v692_v33 = vmax.f32 %v3899_v29, 0.0  ;;  %v686_v37 = vpop.f32.mrb[8].mxu1  ;;  %v1400_v24 = vld [vmem:[#allocation8 + $0x70] sm:$0xff] }
 0x3e7   :  { %v3903_v40 = vadd.f32 %v686_v37, %v609_v18  ;;  %v688_v56 = vpop.f32.mrb[9].mxu1  ;;  %v1298_v18 = vld [vmem:[#allocation5 + $0x478] sm:$0xff]  ;;  %v1090_v37 = vld [vmem:[#allocation5 + $0x2a8] sm:$0xff] }
 0x3e8   :  { %v3905_v42 = vadd.f32 %v688_v56, %v613_v19  ;;  %993 = vmatprep.mubr.f32.mxu0 %v692_v33  ;;  %v3272_v19 = vpack.c.bf16 %v1280_v9, %v1279_v20  ;;  %v3274_v21 = vpack.c.bf16 %v1298_v18, %v1297_v13  ;;  %v3222_v41 = vpack.c.bf16 %v1090_v37, %v1089_v32  ;;  %v1393_v9 = vld [vmem:[#allocation8 + $0x38] sm:$0xff]  ;;  %v1388_v18 = vld [vmem:[#allocation8 + $0x10] sm:$0xff] }
 0x3e9   :  { %994 = vmatmul.mubr.f32.vlgmr.msra.gmra.mrb[6].mxu0 %v691_v25  ;;  %v693_v46 = vmax.f32 %v3903_v40, 0.0  ;;  %v3316_v36 = vpack.c.bf16 %v1392_v26, %v1388_v18  ;;  %v1409_v32 = vld [vmem:[#allocation8 + $0xb8] sm:$0xff] }
 0x3ea   :  { %v694_v8 = vmax.f32 %v3905_v42, 0.0  ;;  %3253 = vmatpush3.bf16.msra.mxu0 %v3252_v61 }
 0x3eb   :  { %3255 = vmatprep.subr.bf16.mxu0 %v3254_v2 }
 0x3ec   :  { %999 = vmatprep.mubr.f32.mxu0 %v694_v8 }
 0x3ed   :  { %1000 = vmatmul.mubr.f32.gmra.mrb[8].mxu0 %v693_v46 }
 0x3ee   :  { %3257 = vmatpush3.bf16.msra.mxu0 %v3256_v45  ;;  %v3226_v45 = vpack.c.bf16 %v1092_v44, %v1091_v43  ;;  %v1412_v44 = vld [vmem:[#allocation8 + $0xd0] sm:$0xff] }
 0x3ef   :  { %3259 = vmatprep.subr.bf16.mxu0 %v3258_v11  ;;  %v1093_v11 = vld [vmem:[#allocation5 + $0x2c0] sm:$0xff] }
 0x3f2   :  { %3261 = vmatpush3.bf16.msra.mxu0 %v3260_v50  ;;  %v1102_v50 = vld [vmem:[#allocation5 + $0x308] sm:$0xff] }
 0x3f3   :  { %3263 = vmatprep.subr.bf16.mxu0 %v3262_v51  ;;  %v3246_v51 = vpack.c.bf16 %v1102_v50, %v1101_v49  ;;  %v1386_v50 = vld [vmem:[#allocation8] sm:$0xff] }
 0x3f6   :  { %3265 = vmatpush3.bf16.msra.mxu0 %v3264_v59  ;;  %v1300_v59 = vld [vmem:[#allocation5 + $0x488] sm:$0xff] }
 0x3f7   :  { %3267 = vmatprep.subr.bf16.mxu0 %v3266_v60  ;;  %v3278_v60 = vpack.c.bf16 %v1300_v59, %v1299_v58  ;;  %v1395_v58 = vld [vmem:[#allocation8 + $0x48] sm:$0xff] }
 0x3f8   :  { %v1399_v59 = vld [vmem:[#allocation8 + $0x68] sm:$0xff] }
 0x3fa   :  { %3269 = vmatpush3.bf16.msra.mxu0 %v3268_v4  ;;  %v1391_v4 = vld [vmem:[#allocation8 + $0x28] sm:$0xff] }
 0x3fb   :  { %3271 = vmatprep.subr.bf16.mxu0 %v3270_v7  ;;  %v1389_v7 = vld [vmem:[#allocation8 + $0x18] sm:$0xff]  ;;  %v3282_v20 = vpack.c.bf16 %v1391_v4, %v1387_v3  ;;  %v3286_v3 = vpack.c.bf16 %v1399_v59, %v1395_v58  ;;  %v1394_v4 = vld [vmem:[#allocation8 + $0x40] sm:$0xff] }
 0x3fc   :  { %v3314_v13 = vpack.c.bf16 %v1393_v9, %v1389_v7  ;;  %v1398_v7 = vld [vmem:[#allocation8 + $0x60] sm:$0xff]  ;;  %v1403_v9 = vld [vmem:[#allocation8 + $0x88] sm:$0xff]  ;;  %v1449_v58 = vld [vmem:[#allocation8 + $0x1f8] sm:$0xff] }
 0x3fd   :  { %v1442_v59 = vld [vmem:[#allocation8 + $0x1c0] sm:$0xff] }
 0x3fe   :  { %3273 = vmatpush3.bf16.msra.mxu0 %v3272_v19  ;;  %v1401_v19 = vld [vmem:[#allocation8 + $0x78] sm:$0xff] }
 0x3ff   :  { %3275 = vmatprep.subr.bf16.mxu0 %v3274_v21  ;;  %v3318_v21 = vpack.c.bf16 %v1401_v19, %v1397_v10  ;;  %v1411_v10 = vld [vmem:[#allocation8 + $0xc8] sm:$0xff] }
 0x400   :  { %v1415_v19 = vld [vmem:[#allocation8 + $0xe8] sm:$0xff] }
 0x401   :  { %v3294_v42 = vpack.c.bf16 %v1415_v19, %v1411_v10 }
 0x402   :  { %v2688_v30 = vpop.f32.mrb[10].mxu1  ;;  %3277 = vmatpush3.bf16.msra.mxu0 %v3276_v27  ;;  %v3320_v27 = vpack.c.bf16 %v1400_v24, %v1396_v23  ;;  %v1414_v23 = vld [vmem:[#allocation8 + $0xe0] sm:$0xff]  ;;  %v1419_v24 = vld [vmem:[#allocation8 + $0x108] sm:$0xff] }
 0x403   :  { %v918_v61 = vpop.f32.mrb[11].mxu1  ;;  %v928_v2 = vmax.f32 %v476_v39, %v2688_v30  ;;  %v1096_v39 = vld [vmem:[#allocation5 + $0x2d8] sm:$0xff]  ;;  %3279 = vmatprep.subr.bf16.mxu0 %v3278_v60  ;;  %v1405_v30 = vld [vmem:[#allocation8 + $0x98] sm:$0xff] }
 0x404   :  { %v927_v56 = vmax.f32 %v475_v38, %v918_v61  ;;  %v3230_v38 = vpack.c.bf16 %v1094_v35, %v1093_v11  ;;  %v3234_v31 = vpack.c.bf16 %v1096_v39, %v1095_v28  ;;  %v3322_v37 = vpack.c.bf16 %v1409_v32, %v1405_v30  ;;  %v1404_v61 = vld [vmem:[#allocation8 + $0x90] sm:$0xff]  ;;  %v1421_v11 = vld [vmem:[#allocation8 + $0x118] sm:$0xff]  ;;  %v1418_v30 = vld [vmem:[#allocation8 + $0x100] sm:$0xff] }
 0x405   :  { %v1425_v35 = vld [vmem:[#allocation8 + $0x138] sm:$0xff]  ;;  %v1420_v39 = vld [vmem:[#allocation8 + $0x110] sm:$0xff]  ;;  %v1422_v32 = vld [vmem:[#allocation8 + $0x120] sm:$0xff] }
 0x406   :  { %2756 = vmatprep.mubr.f32.mxu1 %v927_v56  ;;  %3281 = vmatpush3.bf16.msra.mxu0 %v3280_v63  ;;  %v1408_v56 = vld [vmem:[#allocation8 + $0xb0] sm:$0xff]  ;;  %v3330_v28 = vpack.c.bf16 %v1425_v35, %v1421_v11  ;;  %v1435_v11 = vld [vmem:[#allocation8 + $0x188] sm:$0xff] }
 0x407   :  { %2757 = vmatmul.mubr.f32.vlgmr.msra.gmra.mrb[14].mxu1 %v928_v2  ;;  %3283 = vmatprep.subr.bf16.mxu0 %v3282_v20  ;;  %v1413_v2 = vld [vmem:[#allocation8 + $0xd8] sm:$0xff]  ;;  %v1439_v35 = vld [vmem:[#allocation8 + $0x1a8] sm:$0xff] }
 0x408   :  { %3221 = vmatpush3.bf16.msra.mxu1 %v3885_v6  ;;  %2791 = vmatprep.mubr.f32.mxu1 %v850_v5  ;;  %v1100_v6 = vld [vmem:[#allocation5 + $0x2f8] sm:$0xff]  ;;  %v1417_v5 = vld [vmem:[#allocation8 + $0xf8] sm:$0xff] }
 0x409   :  { %3223 = vmatprep.subr.bf16.mxu1 %v3222_v41  ;;  %v3242_v48 = vpack.c.bf16 %v1100_v6, %v1099_v14  ;;  %v3326_v43 = vpack.c.bf16 %v1417_v5, %v1413_v2  ;;  %v3334_v14 = vpack.c.bf16 %v1433_v12, %v1429_v34  ;;  %v1428_v6 = vld [vmem:[#allocation8 + $0x150] sm:$0xff]  ;;  %v1430_v5 = vld [vmem:[#allocation8 + $0x160] sm:$0xff] }
 0x40a   :  { %v1438_v34 = vld [vmem:[#allocation8 + $0x1a0] sm:$0xff] }
 0x40c   :  { %3225 = vmatpush3.bf16.msra.mxu1 %v3222_v41  ;;  %v3324_v41 = vpack.c.bf16 %v1408_v56, %v1404_v61  ;;  %v1431_v61 = vld [vmem:[#allocation8 + $0x168] sm:$0xff]  ;;  %v3300_v56 = vpack.c.bf16 %v1422_v32, %v1418_v30 }
 0x40d   :  { %3227 = vmatprep.subr.bf16.mxu1 %v3226_v45 }
 0x410   :  { %3229 = vmatpush3.bf16.msra.mxu1 %v3226_v45  ;;  %v1416_v45 = vld [vmem:[#allocation8 + $0xf0] sm:$0xff] }
 0x411   :  { %3231 = vmatprep.subr.bf16.mxu1 %v3230_v38 }
 0x414   :  { %3233 = vmatpush3.bf16.msra.mxu1 %v3230_v38  ;;  %v3328_v38 = vpack.c.bf16 %v1416_v45, %v1412_v44 }
 0x415   :  { %3235 = vmatprep.subr.bf16.mxu1 %v3234_v31 }
 0x418   :  { %3237 = vmatpush3.bf16.msra.mxu1 %v3234_v31  ;;  %v1424_v31 = vld [vmem:[#allocation8 + $0x130] sm:$0xff] }
 0x419   :  { %3239 = vmatprep.subr.bf16.mxu1 %v3238_v47 }
 0x41c   :  { %3241 = vmatpush3.bf16.msra.mxu1 %v3238_v47  ;;  %v3332_v47 = vpack.c.bf16 %v1424_v31, %v1420_v39  ;;  %v1441_v39 = vld [vmem:[#allocation8 + $0x1b8] sm:$0xff]  ;;  %v1434_v31 = vld [vmem:[#allocation8 + $0x180] sm:$0xff] }
 0x41d   :  { %3243 = vmatprep.subr.bf16.mxu1 %v3242_v48 }
 0x420   :  { %3245 = vmatpush3.bf16.msra.mxu1 %v3242_v48  ;;  %v1432_v48 = vld [vmem:[#allocation8 + $0x170] sm:$0xff] }
 0x421   :  { %3247 = vmatprep.subr.bf16.mxu1 %v3246_v51  ;;  %v3336_v49 = vpack.c.bf16 %v1432_v48, %v1428_v6  ;;  %v1440_v6 = vld [vmem:[#allocation8 + $0x1b0] sm:$0xff] }
 0x422   :  { %v3925_v52 = vpop.f32.mrb[12].mxu1 }
 0x423   :  { %v3927_v53 = vpop.f32.mrb[13].mxu1 }
 0x424   :  { %3249 = vmatpush3.bf16.msra.mxu1 %v3246_v51  ;;  %v1390_v51 = vld [vmem:[#allocation8 + $0x20] sm:$0xff] }
 0x425   :  { %3315 = vmatprep.subr.bf16.mxu1 %v3314_v13  ;;  %v3284_v62 = vpack.c.bf16 %v1390_v51, %v1386_v50  ;;  %v1407_v13 = vld [vmem:[#allocation8 + $0xa8] sm:$0xff]  ;;  %v1445_v51 = vld [vmem:[#allocation8 + $0x1d8] sm:$0xff] }
 0x426   :  { %v3290_v22 = vpack.c.bf16 %v1407_v13, %v1403_v9  ;;  %v1447_v50 = vld [vmem:[#allocation8 + $0x1e8] sm:$0xff] }
 0x427   :  { %2792 = vmatmul.mubr.f32.vlgmr.msra.gmra.mrb[14].mxu1 %v851_v57 }
 0x428   :  { %1607 = vmatprep.mubr.f32.mxu1 %v3645_v16  ;;  %3317 = vmatpush1.bf16.msra.mxu1 %v3316_v36  ;;  %v3288_v36 = vpack.c.bf16 %v1398_v7, %v1394_v4  ;;  %v1380_v7 = vsub.s32 6, %v3767_v54 }
 0x429   :  { %3319 = vmatprep.subr.bf16.mxu1 %v3318_v21 }
 0x42c   :  { %3321 = vmatpush1.bf16.msra.mxu1 %v3320_v27  ;;  %v1423_v27 = vld [vmem:[#allocation8 + $0x128] sm:$0xff] }
 0x42d   :  { %3323 = vmatprep.subr.bf16.mxu1 %v3322_v37  ;;  %v1427_v37 = vld [vmem:[#allocation8 + $0x148] sm:$0xff] }
 0x42e   :  { %v3302_v2 = vpack.c.bf16 %v1431_v61, %v1427_v37 }
 0x430   :  { %3325 = vmatpush1.bf16.msra.mxu1 %v3324_v41  ;;  %v1426_v41 = vld [vmem:[#allocation8 + $0x140] sm:$0xff] }
 0x431   :  { %3327 = vmatprep.subr.bf16.mxu1 %v3326_v43  ;;  %v3304_v43 = vpack.c.bf16 %v1430_v5, %v1426_v41 }
 0x434   :  { %3329 = vmatpush1.bf16.msra.mxu1 %v3328_v38  ;;  %v1437_v38 = vld [vmem:[#allocation8 + $0x198] sm:$0xff] }
 0x435   :  { %3331 = vmatprep.subr.bf16.mxu1 %v3330_v28  ;;  %v3306_v28 = vpack.c.bf16 %v1439_v35, %v1435_v11  ;;  %v3338_v12 = vpack.c.bf16 %v1441_v39, %v1437_v38 }
 0x438   :  { %3333 = vmatpush1.bf16.msra.mxu1 %v3332_v47  ;;  %v3308_v47 = vpack.c.bf16 %v1438_v34, %v1434_v31 }
 0x439   :  { %3335 = vmatprep.subr.bf16.mxu1 %v3334_v14  ;;  %v1436_v14 = vld [vmem:[#allocation8 + $0x190] sm:$0xff] }
 0x43a   :  { %v3340_v48 = vpack.c.bf16 %v1440_v6, %v1436_v14 }
 0x43c   :  { %3337 = vmatpush1.bf16.msra.mxu1 %v3336_v49  ;;  %v1443_v49 = vld [vmem:[#allocation8 + $0x1c8] sm:$0xff] }
 0x43d   :  { %3339 = vmatprep.subr.bf16.mxu1 %v3338_v12 }
 0x440   :  { %3341 = vmatpush1.bf16.msra.mxu1 %v3340_v48 }
 0x4bc   :  { %v995_v57 = vpop.f32.mrb[6].mxu0 }
 0x4bd   :  { %v997_v60 = vpop.f32.mrb[7].mxu0  ;;  %v1006_v63 = vmax.f32 %v691_v25, %v995_v57  ;;  %v1406_v25 = vld [vmem:[#allocation8 + $0xa0] sm:$0xff]  ;;  %v3310_v57 = vpack.c.bf16 %v1447_v50, %v1443_v49  ;;  %v1621_v50 = vld [vmem:[#allocation5 + $0x498] sm:$0xff] }
 0x4be   :  { %v1007_v17 = vmax.f32 %v692_v33, %v997_v60  ;;  %v1402_v33 = vld [vmem:[#allocation8 + $0x80] sm:$0xff] }
 0x4bf   :  { %v3292_v21 = vpack.c.bf16 %v1406_v25, %v1402_v33  ;;  %v1446_v60 = vld [vmem:[#allocation8 + $0x1e0] sm:$0xff]  ;;  %v1085_v33 = vmax.f32 %v3775_v0, %v3927_v53 }
 0x4c0   :  { %v1001_v20 = vpop.f32.mrb[8].mxu0  ;;  %1365 = vmatprep.mubr.f32.mxu0 %v1007_v17  ;;  %v3342_v17 = vpack.c.bf16 %v1449_v58, %v1445_v51  ;;  %v1620_v49 = vld [vmem:[#allocation5 + $0x490] sm:$0xff]  ;;  %v1622_v51 = vld [vmem:[#allocation5 + $0x4a0] sm:$0xff]  ;;  %v1623_v58 = vld [vmem:[#allocation5 + $0x4a8] sm:$0xff] }
 0x4c1   :  { %v1003_v18 = vpop.f32.mrb[9].mxu0  ;;  %1366 = vmatmul.mubr.f32.vlgmr.msra.gmra.mrb[10].mxu0 %v1006_v63  ;;  %v1008_v29 = vmax.f32 %v693_v46, %v1001_v20  ;;  %v3298_v46 = vpack.c.bf16 %v1423_v27, %v1419_v24  ;;  %v1444_v63 = vld [vmem:[#allocation8 + $0x1d0] sm:$0xff]  ;;  %v3950_v24 = vsub.s32 7, %v3767_v54 }
 0x4c2   :  { %v1009_v26 = vmax.f32 %v694_v8, %v1003_v18  ;;  %3285 = vmatpush1.bf16.msra.mxu0 %v3284_v62  ;;  %v1410_v8 = vld [vmem:[#allocation8 + $0xc0] sm:$0xff]  ;;  %v3312_v62 = vpack.c.bf16 %v1446_v60, %v1442_v59  ;;  %3343 = vmatprep.subr.bf16.mxu1 %v3342_v17  ;;  %v3977_v59 = vpack.c.bf16 %v1623_v58, %v1622_v51 }
 0x4c3   :  { %3287 = vmatprep.subr.bf16.mxu0 %v3286_v3  ;;  %v3296_v40 = vpack.c.bf16 %v1414_v23, %v1410_v8  ;;  %v1448_v3 = vld [vmem:[#allocation8 + $0x1f0] sm:$0xff]  ;;  %v3493_v18 = vld [vmem:[#allocation10] sm:$0xff] }
 0x4c4   :  { %1370 = vmatprep.mubr.f32.mxu0 %v1009_v26  ;;  %v3344_v4 = vpack.c.bf16 %v1448_v3, %v1444_v63  ;;  %v1381_v26 = vrot.slane %v3493_v18, %v1380_v7  ;;  %v1453_v0 = vrot.slane %v3493_v18, %v3950_v24 }
 0x4c5   :  { %1371 = vmatmul.mubr.f32.gmra.mrb[12].mxu0 %v1008_v29 }
 0x4c6   :  { %3289 = vmatpush1.bf16.msra.mxu0 %v3288_v36  ;;  %1530 = vmatprep.mubr.f32.mxu0 %v3645_v16 }
 0x4c7   :  { %3291 = vmatprep.subr.bf16.mxu0 %v3290_v22  ;;  %3345 = vmatpush1.bf16.msra.mxu1 %v3344_v4 }
 0x4ca   :  { %3293 = vmatpush1.bf16.msra.mxu0 %v3292_v21 }
 0x4cb   :  { %3295 = vmatprep.subr.bf16.mxu0 %v3294_v42  ;;  %v1086_v42 = vmax.f32 %v3777_v1, %v3925_v52 }
 0x4ce   :  { %3297 = vmatpush1.bf16.msra.mxu0 %v3296_v40 }
 0x4cf   :  { %3299 = vmatprep.subr.bf16.mxu0 %v3298_v46 }
 0x4d2   :  { %3301 = vmatpush1.bf16.msra.mxu0 %v3300_v56 }
 0x4d3   :  { %3303 = vmatprep.subr.bf16.mxu0 %v3302_v2 }
 0x4d6   :  { %3305 = vmatpush1.bf16.msra.mxu0 %v3304_v43 }
 0x4d7   :  { %3307 = vmatprep.subr.bf16.mxu0 %v3306_v28 }
 0x4da   :  { %3309 = vmatpush1.bf16.msra.mxu0 %v3308_v47 }
 0x4db   :  { %3311 = vmatprep.subr.bf16.mxu0 %v3310_v57  ;;  %v3975_v57 = vpack.c.bf16 %v1621_v50, %v1620_v49 }
 0x4dd   :  { %3347 = vmatprep.subr.bf16.mxu1 %v3975_v57 }
 0x4de   :  { %3313 = vmatpush1.bf16.msra.mxu0 %v3312_v62 }
 0x4df   :  { %3355 = vmatprep.subr.bf16.mxu0 %v3975_v57 }
 0x4fa   :  { %v2793_v44 = vpop.f32.mrb[14].mxu1 }
 0x4fb   :  { %v1260_v45 = vpop.f32.mrb[15].mxu1 }
 0x594   :  { %v2430_v20 = vpop.f32.mrb[10].mxu0 }
 0x595   :  { %v2431_v9 = vpop.f32.mrb[11].mxu0 }
 0x596   :  { %v2432_v13 = vadd.f32 %v2431_v9, %v2430_v20  ;;  %v1457_v9 = vrot.slane %v3893_v15, %v3950_v24 }
 0x598   :  { %v1376_v36 = vadd.f32 %v2432_v13, %v1260_v45  ;;  %v2433_v29 = vpop.f32.mrb[12].mxu0 }
 0x599   :  { %v2434_v22 = vpop.f32.mrb[13].mxu0 }
 0x59a   :  { %v1382_v25 = vadd.f32 %v1381_v26, %v1376_v36  ;;  %v2435_v10 = vadd.f32 %v2434_v22, %v2433_v29 }
 0x59c   :  { %v1384_v19 = vadd.f32 %v1382_v25, %v1085_v33  ;;  %v1377_v21 = vadd.f32 %v2793_v44, %v2435_v10 }
 0x59e   :  { %v1383_v8 = vadd.f32 %v1381_v26, %v1377_v21  ;;  %1531 = vmatmul.mubr.f32.vlgmr.msra.gmra.mrb[14].mxu0 %v1384_v19  ;;  %1608 = vmatmul.mubr.f32.vlgmr.msra.gmra.mrb[16].mxu1 %v1384_v19 }
 0x59f   :  { %1536 = vmatprep.mubr.f32.mxu0 %v3645_v16  ;;  %1613 = vmatprep.mubr.f32.mxu1 %v3645_v16 }
 0x5a0   :  { %v1385_v23 = vadd.f32 %v1383_v8, %v1086_v42  ;;  %3349 = vmatpush3.bf16.msra.mxu1 %v3975_v57  ;;  %3357 = vmatpush3.bf16.msra.mxu0 %v3975_v57 }
 0x5a1   :  { %3351 = vmatprep.subr.bf16.mxu1 %v3977_v59  ;;  %3359 = vmatprep.subr.bf16.mxu0 %v3977_v59 }
 0x5a2   :  { %1537 = vmatmul.mubr.f32.gmra.mrb[16].mxu0 %v1385_v23  ;;  %1614 = vmatmul.mubr.f32.gmra.mrb[18].mxu1 %v1385_v23 }
 0x5a4   :  { %3353 = vmatpush3.bf16.msra.mxu1 %v3977_v59  ;;  %3361 = vmatpush3.bf16.msra.mxu0 %v3977_v59 }
 0x5a5   :  { %3363 = vmatprep.subr.bf16.mxu0 %v3975_v57 }
 0x671   :  { %v1532_v53 = vpop.f32.mrb[14].mxu0  ;;  %v3953_v27 = vpop.f32.mrb[16].mxu1 }
 0x672   :  { %v1533_v40 = vadd.f32 %v1532_v53, %v1453_v0  ;;  %v3955_v1 = vpop.f32.mrb[15].mxu0  ;;  %v3957_v52 = vpop.f32.mrb[17].mxu1 }
 0x673   :  { %v1535_v18 = vadd.f32 %v3955_v1, %v1457_v9 }
 0x674   :  { %3429 = vtanh.f32 %v1533_v40  ;;  %v2218_v2 = vmul.f32 -1.442695, %v1533_v40 }
 0x675   :  { %v1538_v46 = vpop.f32.mrb[16].mxu0  ;;  %v3959_v30 = vpop.f32.mrb[18].mxu1 }
 0x676   :  { %v1539_v16 = vadd.f32 %v1538_v46, %v1453_v0  ;;  %v3961_v32 = vpop.f32.mrb[17].mxu0  ;;  %v3963_v37 = vpop.f32.mrb[19].mxu1 }
 0x677   :  { %v1541_v13 = vadd.f32 %v3961_v32, %v1457_v9 }
 0x678   :  { %3431 = vtanh.f32 %v1539_v16  ;;  %v2219_v41 = vmul.f32 -1.442695, %v1539_v16 }
 0x679   :  { %3433 = vpow2.f32 %v2218_v2 }
 0x67a   :  { %3435 = vpow2.f32 %v2219_v41 }
 0x67e   :  { %v3430_v61 = vpop.eup %3429 }
 0x67f   :  { %1642 = vrot.lane.b32.xlu0 %v3430_v61, %s3646_s4 }
 0x682   :  { %v3432_v56 = vpop.eup %3431 }
 0x683   :  { %1644 = vrot.lane.b32.xlu0 %v3432_v56, %s3646_s4  ;;  %v3434_v5 = vpop.eup %3433 }
 0x684   :  { %v1630_v43 = vadd.f32 1.0, %v3434_v5  ;;  %v3436_v44 = vpop.eup %3435 }
 0x685   :  { %v1631_v45 = vadd.f32 1.0, %v3436_v44 }
 0x686   :  { %3437 = vrcp.f32 %v1630_v43 }
 0x687   :  { %3439 = vrcp.f32 %v1631_v45 }
 0x690   :  { %v3438_v11 = vpop.eup %3437 }
 0x691   :  { %v3440_v28 = vpop.eup %3439  ;;  %v1638_v34 = vmul.f32 0.0, %v3438_v11 }
 0x692   :  { %v1639_v14 = vmul.f32 0.0, %v3440_v28 }
 0x6f1   :  { %v1643_v35 = vpop.permute.xlu0 %1642 }
 0x6f2   :  { %v1648_v38 = vmul.f32 %v3438_v11, %v1643_v35 }
 0x6f4   :  { %1652 = vrot.lane.b32.xlu1 %v1648_v38, %s3639_s17 }
 0x6f5   :  { %v1645_v39 = vpop.permute.xlu0 %1644 }
 0x6f6   :  { %v1649_v31 = vmul.f32 %v3440_v28, %v1645_v39 }
 0x6f8   :  { %1654 = vrot.lane.b32.xlu1 %v1649_v31, %s3639_s17  ;;  %v91_v31 = vld [vmem:[#allocation10 + $0x10] sm:$0xff] }
 0x766   :  { %v1653_v12 = vpop.permute.xlu1 %1652 }
 0x767   :  { %v3969_v47 = vadd.f32 %v1653_v12, %v1638_v34  ;;  %v1461_v34 = vrot.slane %v91_v31, %v3950_v24 }
 0x769   :  { %3441 = vtanh.f32 %v3969_v47  ;;  %v1616_v12 = vadd.f32 %v3959_v30, %v1461_v34 }
 0x76a   :  { %v1655_v6 = vpop.permute.xlu1 %1654 }
 0x76b   :  { %v3972_v48 = vadd.f32 %v1655_v6, %v1639_v14 }
 0x76d   :  { %3443 = vtanh.f32 %v3972_v48 }
 0x773   :  { %v3442_v60 = vpop.eup %3441 }
 0x774   :  { %1664 = vrot.lane.b32.xlu0 %v3442_v60, %s3646_s4 }
 0x777   :  { %v3444_v17 = vpop.eup %3443 }
 0x778   :  { %1666 = vrot.lane.b32.xlu1 %v3444_v17, %s3646_s4 }
 0x7e6   :  { %v1665_v62 = vpop.permute.xlu0 %1664 }
 0x7e7   :  { %v1670_v63 = vmul.f32 %v3438_v11, %v1665_v62 }
 0x7e9   :  { %1674 = vrot.lane.b32.xlu0 %v1670_v63, %s3639_s17 }
 0x7ea   :  { %v1667_v3 = vpop.permute.xlu1 %1666 }
 0x7eb   :  { %v1671_v4 = vmul.f32 %v3440_v28, %v1667_v3 }
 0x7ed   :  { %1676 = vrot.lane.b32.xlu1 %v1671_v4, %s3639_s17 }
 0x85b   :  { %v3992_v7 = vpop.permute.xlu0 %1674 }
 0x85c   :  { %2802 = vmatprep.mubr.msk.f32.mxu1 %vm1678_vm1, %v3992_v7 }
 0x85f   :  { %v3996_v20 = vpop.permute.xlu1 %1676 }
 0x860   :  { %2803 = vmatmul.mubr.msk.f32.vlgmr.msra.gmra.mrb[20].mxu1 %vm1678_vm1, %v3996_v20 }
 0x933   :  { %v2804_v26 = vpop.f32.mrb[20].mxu1 }
 0x934   :  { %v1759_v36 = vadd.f32 %v2804_v26, %v1541_v13  ;;  %v1749_v29 = vpop.f32.mrb[21].mxu1 }
 0x935   :  { %v1758_v22 = vadd.f32 %v1749_v29, %v1535_v18 }
 0x936   :  { %3445 = vtanh.f32 %v1759_v36  ;;  %v2223_v10 = vmul.f32 -1.442695, %v1759_v36 }
 0x937   :  { %3447 = vtanh.f32 %v1758_v22  ;;  %v2222_v19 = vmul.f32 -1.442695, %v1758_v22 }
 0x938   :  { %3449 = vpow2.f32 %v2223_v10 }
 0x939   :  { %3451 = vpow2.f32 %v2222_v19 }
 0x940   :  { %v3446_v33 = vpop.eup %3445 }
 0x941   :  { %v3448_v25 = vpop.eup %3447  ;;  %1780 = vrot.lane.b32.xlu1 %v3446_v33, %s3646_s4 }
 0x942   :  { %1778 = vrot.lane.b32.xlu0 %v3448_v25, %s3646_s4  ;;  %v3450_v15 = vpop.eup %3449 }
 0x943   :  { %v3452_v21 = vpop.eup %3451  ;;  %v1767_v42 = vadd.f32 1.0, %v3450_v15 }
 0x944   :  { %v1766_v8 = vadd.f32 1.0, %v3452_v21 }
 0x945   :  { %3453 = vrcp.f32 %v1767_v42 }
 0x946   :  { %3455 = vrcp.f32 %v1766_v8 }
 0x94f   :  { %v3454_v23 = vpop.eup %3453 }
 0x950   :  { %v3456_v53 = vpop.eup %3455  ;;  %v1775_v16 = vmul.f32 %v3454_v23, %v3972_v48 }
 0x951   :  { %v1774_v61 = vmul.f32 %v3456_v53, %v3969_v47  ;;  %v1610_v47 = vadd.f32 %v3953_v27, %v1461_v34 }
 0x9b3   :  { %v1781_v0 = vpop.permute.xlu1 %1780 }
 0x9b4   :  { %v1785_v40 = vmul.f32 %v3454_v23, %v1781_v0  ;;  %v1779_v1 = vpop.permute.xlu0 %1778  ;;  %v92_v0 = vld [vmem:[#allocation10 + $0x18] sm:$0xff] }
 0x9b5   :  { %v1784_v46 = vmul.f32 %v3456_v53, %v1779_v1 }
 0x9b6   :  { %1790 = vrot.lane.b32.xlu1 %v1785_v40, %s3639_s17 }
 0x9b7   :  { %1788 = vrot.lane.b32.xlu0 %v1784_v46, %s3639_s17 }
 0xa28   :  { %v1791_v32 = vpop.permute.xlu1 %1790 }
 0xa29   :  { %v1795_v56 = vadd.f32 %v1791_v32, %v1775_v16  ;;  %v1789_v2 = vpop.permute.xlu0 %1788 }
 0xa2a   :  { %v1794_v41 = vadd.f32 %v1789_v2, %v1774_v61 }
 0xa2b   :  { %3457 = vtanh.f32 %v1795_v56 }
 0xa2c   :  { %3459 = vtanh.f32 %v1794_v41 }
 0xa35   :  { %v3458_v5 = vpop.eup %3457 }
 0xa36   :  { %v3460_v43 = vpop.eup %3459  ;;  %1802 = vrot.lane.b32.xlu1 %v3458_v5, %s3646_s4 }
 0xa37   :  { %1800 = vrot.lane.b32.xlu0 %v3460_v43, %s3646_s4 }
 0xaa8   :  { %v1803_v44 = vpop.permute.xlu1 %1802 }
 0xaa9   :  { %v4012_v45 = vmul.f32 %v3454_v23, %v1803_v44  ;;  %v1801_v11 = vpop.permute.xlu0 %1800 }
 0xaaa   :  { %v4014_v35 = vmul.f32 %v3456_v53, %v1801_v11  ;;  %v1465_v53 = vrot.slane %v92_v0, %v3950_v24 }
 0xaab   :  { %1812 = vrot.lane.b32.xlu1 %v4012_v45, %s3639_s17 }
 0xaac   :  { %v3419_v38 = vpack.i.bf16 %v4012_v45, %v4014_v35  ;;  %1810 = vrot.lane.b32.xlu0 %v4014_v35, %s3639_s17  ;;  %v1618_v40 = vadd.f32 %v3963_v37, %v1465_v53  ;;  %v1612_v1 = vadd.f32 %v3957_v52, %v1465_v53  ;;  %v2108_v35 = vld [vmem:[#allocation5 + $0x4f0] sm:$0xff] }
 0xb1d   :  { %v1813_v39 = vpop.permute.xlu1 %1812 }
 0xb1e   :  { %v1811_v28 = vpop.permute.xlu0 %1810 }
 0xb1f   :  { %2813 = vmatprep.mubr.msk.f32.mxu0 %vm1678_vm1, %v1811_v28 }
 0xb20   :  { %2814 = vmatmul.mubr.msk.f32.vlgmr.msra.gmra.mrb[18].mxu0 %vm1678_vm1, %v1813_v39 }
 0xb21   :  { %3365 = vmatpush3.bf16.msra.mxu0 %v3975_v57 }
 0xb22   :  { %3367 = vmatprep.subr.bf16.mxu0 %v3977_v59 }
 0xb25   :  { %3369 = vmatpush3.bf16.msra.mxu0 %v3977_v59 }
 0xbf3   :  { %v2815_v14 = vpop.f32.mrb[18].mxu0 }
 0xbf4   :  { %v1894_v6 = vadd.f32 %v2815_v14, %v1616_v12  ;;  %v1884_v48 = vpop.f32.mrb[19].mxu0  ;;  %v2100_v12 = vld [vmem:[#allocation5 + $0x4b0] sm:$0xff]  ;;  %v2102_v14 = vld [vmem:[#allocation5 + $0x4c0] sm:$0xff] }
 0xbf5   :  { %v1893_v49 = vadd.f32 %v1884_v48, %v1610_v47  ;;  %v2101_v47 = vld [vmem:[#allocation5 + $0x4b8] sm:$0xff]  ;;  %v2103_v48 = vld [vmem:[#allocation5 + $0x4c8] sm:$0xff] }
 0xbf6   :  { %3461 = vtanh.f32 %v1894_v6  ;;  %v2227_v57 = vmul.f32 -1.442695, %v1894_v6  ;;  %v3370_v6 = vpack.c.bf16 %v2101_v47, %v2100_v12 }
 0xbf7   :  { %3463 = vtanh.f32 %v1893_v49  ;;  %v2226_v58 = vmul.f32 -1.442695, %v1893_v49  ;;  %v3374_v49 = vpack.c.bf16 %v2103_v48, %v2102_v14 }
 0xbf8   :  { %3465 = vpow2.f32 %v2227_v57  ;;  %3371 = vmatprep.subr.bf16.mxu0 %v3370_v6 }
 0xbf9   :  { %3467 = vpow2.f32 %v2226_v58  ;;  %v2106_v58 = vld [vmem:[#allocation5 + $0x4e0] sm:$0xff] }
 0xc00   :  { %v3462_v50 = vpop.eup %3461 }
 0xc01   :  { %v3464_v51 = vpop.eup %3463  ;;  %1915 = vrot.lane.b32.xlu1 %v3462_v50, %s3646_s4  ;;  %v2104_v50 = vld [vmem:[#allocation5 + $0x4d0] sm:$0xff] }
 0xc02   :  { %1913 = vrot.lane.b32.xlu0 %v3464_v51, %s3646_s4  ;;  %v3466_v59 = vpop.eup %3465  ;;  %v2105_v51 = vld [vmem:[#allocation5 + $0x4d8] sm:$0xff] }
 0xc03   :  { %v3468_v30 = vpop.eup %3467  ;;  %v1902_v60 = vadd.f32 1.0, %v3466_v59  ;;  %v3378_v57 = vpack.c.bf16 %v2105_v51, %v2104_v50  ;;  %v2107_v59 = vld [vmem:[#allocation5 + $0x4e8] sm:$0xff] }
 0xc04   :  { %v1901_v27 = vadd.f32 1.0, %v3468_v30  ;;  %v3382_v45 = vpack.c.bf16 %v2107_v59, %v2106_v58 }
 0xc05   :  { %3469 = vrcp.f32 %v1902_v60  ;;  %v2110_v60 = vld [vmem:[#allocation5 + $0x500] sm:$0xff] }
 0xc06   :  { %3471 = vrcp.f32 %v1901_v27  ;;  %v2111_v27 = vld [vmem:[#allocation5 + $0x508] sm:$0xff] }
 0xc0f   :  { %v3470_v17 = vpop.eup %3469 }
 0xc10   :  { %v3472_v63 = vpop.eup %3471  ;;  %v1910_v13 = vmul.f32 %v3470_v17, %v1795_v56 }
 0xc11   :  { %v1909_v26 = vmul.f32 %v3472_v63, %v1794_v41 }
 0xc73   :  { %v1916_v62 = vpop.permute.xlu1 %1915 }
 0xc74   :  { %v1920_v3 = vmul.f32 %v3470_v17, %v1916_v62  ;;  %v1914_v4 = vpop.permute.xlu0 %1913  ;;  %v2112_v62 = vld [vmem:[#allocation5 + $0x510] sm:$0xff] }
 0xc75   :  { %v1919_v9 = vmul.f32 %v3472_v63, %v1914_v4 }
 0xc76   :  { %1925 = vrot.lane.b32.xlu1 %v1920_v3, %s3639_s17 }
 0xc77   :  { %1923 = vrot.lane.b32.xlu0 %v1919_v9, %s3639_s17 }
 0xce8   :  { %v1926_v18 = vpop.permute.xlu1 %1925 }
 0xce9   :  { %v4034_v36 = vadd.f32 %v1926_v18, %v1910_v13  ;;  %v1924_v29 = vpop.permute.xlu0 %1923 }
 0xcea   :  { %v4036_v22 = vadd.f32 %v1924_v29, %v1909_v26  ;;  %v2114_v29 = vld [vmem:[#allocation5 + $0x520] sm:$0xff] }
 0xceb   :  { %3473 = vtanh.f32 %v4034_v36 }
 0xcec   :  { %3475 = vtanh.f32 %v4036_v22 }
 0xcf5   :  { %v3474_v33 = vpop.eup %3473 }
 0xcf6   :  { %v3476_v25 = vpop.eup %3475  ;;  %1937 = vrot.lane.b32.xlu1 %v3474_v33, %s3646_s4  ;;  %v2115_v33 = vld [vmem:[#allocation5 + $0x528] sm:$0xff] }
 0xcf7   :  { %1935 = vrot.lane.b32.xlu0 %v3476_v25, %s3646_s4  ;;  %v3398_v25 = vpack.c.bf16 %v2115_v33, %v2114_v29 }
 0xd68   :  { %v1938_v10 = vpop.permute.xlu1 %1937 }
 0xd69   :  { %v1942_v19 = vmul.f32 %v3470_v17, %v1938_v10  ;;  %v1936_v15 = vpop.permute.xlu0 %1935  ;;  %v3390_v17 = vpack.c.bf16 %v2111_v27, %v2110_v60 }
 0xd6a   :  { %v1941_v21 = vmul.f32 %v3472_v63, %v1936_v15  ;;  %v2113_v63 = vld [vmem:[#allocation5 + $0x518] sm:$0xff] }
 0xd6b   :  { %1947 = vrot.lane.b32.xlu1 %v1942_v19, %s3639_s17  ;;  %v3394_v3 = vpack.c.bf16 %v2113_v63, %v2112_v62 }
 0xd6c   :  { %v3424_v42 = vpack.i.bf16 %v1942_v19, %v1941_v21  ;;  %1945 = vrot.lane.b32.xlu0 %v1941_v21, %s3639_s17 }
 0xddd   :  { %v1948_v23 = vpop.permute.xlu1 %1947 }
 0xdde   :  { %v1946_v8 = vpop.permute.xlu0 %1945 }
 0xddf   :  { %2824 = vmatprep.mubr.msk.f32.mxu0 %vm1678_vm1, %v1946_v8 }
 0xde0   :  { %2825 = vmatmul.mubr.msk.f32.vlgmr.msra.gmra.mrb[20].mxu0 %vm1678_vm1, %v1948_v23 }
 0xde1   :  { %3373 = vmatpush3.bf16.msra.mxu0 %v3370_v6 }
 0xde2   :  { %3375 = vmatprep.subr.bf16.mxu0 %v3374_v49 }
 0xde5   :  { %3377 = vmatpush3.bf16.msra.mxu0 %v3374_v49 }
 0xde6   :  { %3379 = vmatprep.subr.bf16.mxu0 %v3378_v57 }
 0xde9   :  { %3381 = vmatpush3.bf16.msra.mxu0 %v3378_v57 }
 0xdea   :  { %3383 = vmatprep.subr.bf16.mxu0 %v3382_v45 }
 0xded   :  { %3385 = vmatpush3.bf16.msra.mxu0 %v3382_v45 }
 0xeb3   :  { %v2826_v46 = vpop.f32.mrb[20].mxu0 }
 0xeb4   :  { %v2029_v16 = vadd.f32 %v2826_v46, %v1618_v40  ;;  %v2019_v32 = vpop.f32.mrb[21].mxu0 }
 0xeb5   :  { %v2028_v61 = vadd.f32 %v2019_v32, %v1612_v1 }
 0xeb6   :  { %3477 = vtanh.f32 %v2029_v16  ;;  %v2231_v41 = vmul.f32 -1.442695, %v2029_v16 }
 0xeb7   :  { %3479 = vtanh.f32 %v2028_v61  ;;  %v2230_v5 = vmul.f32 -1.442695, %v2028_v61 }
 0xeb8   :  { %3481 = vpow2.f32 %v2231_v41  ;;  %v93_v41 = vld [vmem:[#allocation10 + $0x20] sm:$0xff] }
 0xeb9   :  { %3483 = vpow2.f32 %v2230_v5  ;;  %v2119_v5 = vrot.slane %v93_v41, %v100_v55 }
 0xec0   :  { %v3478_v56 = vpop.eup %3477 }
 0xec1   :  { %v3480_v2 = vpop.eup %3479  ;;  %2050 = vrot.lane.b32.xlu1 %v3478_v56, %s3646_s4 }
 0xec2   :  { %2048 = vrot.lane.b32.xlu0 %v3480_v2, %s3646_s4  ;;  %v3482_v24 = vpop.eup %3481 }
 0xec3   :  { %v3484_v37 = vpop.eup %3483  ;;  %v2037_v43 = vadd.f32 1.0, %v3482_v24 }
 0xec4   :  { %v2036_v52 = vadd.f32 1.0, %v3484_v37 }
 0xec5   :  { %3485 = vrcp.f32 %v2037_v43 }
 0xec6   :  { %3487 = vrcp.f32 %v2036_v52 }
 0xecf   :  { %v4051_v44 = vpop.eup %3485 }
 0xed0   :  { %v4053_v28 = vpop.eup %3487  ;;  %v2045_v18 = vmul.f32 %v4051_v44, %v4034_v36 }
 0xed1   :  { %v2044_v4 = vmul.f32 %v4053_v28, %v4036_v22 }
 0xf33   :  { %v2051_v11 = vpop.permute.xlu1 %2050 }
 0xf34   :  { %v2055_v39 = vmul.f32 %v4051_v44, %v2051_v11  ;;  %v2049_v31 = vpop.permute.xlu0 %2048 }
 0xf35   :  { %v2054_v34 = vmul.f32 %v4053_v28, %v2049_v31 }
 0xf36   :  { %2060 = vrot.lane.b32.xlu1 %v2055_v39, %s3639_s17 }
 0xf37   :  { %2058 = vrot.lane.b32.xlu0 %v2054_v34, %s3639_s17  ;;  %s3648_s17 = smov [#allocation11]  }
 0xf38   :  { %s2202_s9 = sshll.u32 %s3648_s17, 4  ;;  %s2203_s9 = int_to_ptr.vmem [resolvable:$true] %s2202_s9 }
 0xf39   :  { %s3604_s10 = scalar_lea.vmem %s2203_s9, 256  ;;  %p3609_p13 = scmp.lt.s32.totalorder %s2203_s9, %s2203_s9 }
 0xf3a   :  { %3420 = vrot.lane.b32.xlu1 %v3419_v38, %s3646_s4  ;;  %v2109_v38 = vld [vmem:[#allocation5 + $0x4f8] sm:$0xff]  ;;  %p3605_p12 = scmp.ne.s32.totalorder %s2203_s9, %s3604_s10  ;;  %p3610_p0 = scmp.lt.s32.totalorder %s3604_s10, %s3604_s10 }
 0xf3b   :  { %v3386_v30 = vpack.c.bf16 %v2109_v38, %v2108_v35 }
 0xf3c   :  { %p3611_p1 = por %p3610_p0, %p3609_p13 }
 0xf3d   :  { %3387 = vmatprep.subr.bf16.mxu0 %v3386_v30 }
 0xf3e   :  { %3425 = vrot.lane.b32.xlu1 %v3424_v42, %s3647_s1  ;;  %3389 = vmatpush3.bf16.msra.mxu0 %v3386_v30  ;;  %p3612_p2 = pnand %p3611_p1, %p3605_p12 }
 0xf3f   :  { %3391 = vmatprep.subr.bf16.mxu0 %v3390_v17 }
 0xf42   :  { %3393 = vmatpush3.bf16.msra.mxu0 %v3390_v17 }
 0xf43   :  { %3395 = vmatprep.subr.bf16.mxu0 %v3394_v3 }
 0xf46   :  { %3397 = vmatpush3.bf16.msra.mxu0 %v3394_v3 }
 0xf47   :  { %3399 = vmatprep.subr.bf16.mxu0 %v3398_v25 }
 0xf4a   :  { %3401 = vmatpush3.bf16.msra.mxu0 %v3398_v25 }
 0xfa8   :  { %v2061_v9 = vpop.permute.xlu1 %2060 }
 0xfa9   :  { %v2059_v13 = vpop.permute.xlu0 %2058  ;;  %v2065_v10 = vadd.f32 %v2061_v9, %v2045_v18 }
 0xfaa   :  { %v2064_v26 = vadd.f32 %v2059_v13, %v2044_v4 }
 0xfac   :  { %3489 = vtanh.f32 %v2064_v26  ;;  %v3421_v22 = vpop.permute.xlu1 %3420 }
 0xfad   :  { %3491 = vtanh.f32 %v2065_v10  ;;  %v3422_v42 = vunpack.i.l.bf16 %v3421_v22  ;;  %v3423_v23 = vunpack.i.h.bf16 %v3421_v22 }
 0xfaf   :  { %v2092_v53 = vsel %vm1678_vm1, %v3992_v7, %v3422_v42  ;;  %v2093_v32 = vsel %vm1678_vm1, %v3996_v20, %v3423_v23 }
 0xfb0   :  { %v3426_v21 = vpop.permute.xlu1 %3425 }
 0xfb1   :  { %v3427_v8 = vunpack.i.l.bf16 %v3426_v21  ;;  %v3428_v40 = vunpack.i.h.bf16 %v3426_v21 }
 0xfb3   :  { %v2095_v1 = vsel %vm2094_vm2, %v2092_v53, %v3427_v8  ;;  %v2096_v56 = vsel %vm2094_vm2, %v2093_v32, %v3428_v40 }
 0xfb6   :  { %v3490_v19 = vpop.eup %3489 }
 0xfb7   :  { %2070 = vrot.lane.b32.xlu0 %v3490_v19, %s3646_s4  ;;  %v3492_v15 = vpop.eup %3491 }
 0xfbb   :  { %2072 = vrot.lane.b32.xlu0 %v3492_v15, %s3646_s4 }
0x1029   :  { %v2071_v36 = vpop.permute.xlu0 %2070 }
0x102a   :  { %v2076_v0 = vmul.f32 %v4053_v28, %v2071_v36 }
0x102c   :  { %v2098_v46 = vsel %vm2097_vm3, %v2095_v1, %v2076_v0 }
0x102d   :  { %2859 = vmatprep.mubr.f32.mxu0 %v2098_v46  ;;  %v2073_v16 = vpop.permute.xlu0 %2072 }
0x102e   :  { %v2077_v61 = vmul.f32 %v4051_v44, %v2073_v16 }
0x1030   :  { %v2099_v2 = vsel %vm2097_vm3, %v2096_v56, %v2077_v61 }
0x1031   :  { %2860 = vmatmul.mubr.f32.vlgmr.msra.gmra.mrb[22].mxu0 %v2099_v2 }
0x1104   :  { %v2861_v7 = vpop.f32.mrb[22].mxu0 }
0x1105   :  { %v2192_v24 = vadd.f32 %v2861_v7, %v2119_v5  ;;  %v2186_v37 = vpop.f32.mrb[23].mxu0 }
0x1106   :  { %v2187_v43 = vadd.f32 %v2186_v37, %v2119_v5 }
0x1107   :  { %2196 = vst [vmem:[#allocation11 + $0x8] sm:$0xff] %v2192_v24 }
0x1108   :  { %2195 = vst [vmem:[#allocation11] sm:$0xff] %v2187_v43 }
0x1109   :  { %3615 = shalt.err (!%p3612_p2)
}
0x110a   :  { %s3616_s13 = scalar_lea.hbm %s4097_s5, 256 }
0x110b   :  { %p3617_p3 = scmp.ne.s32.totalorder %s4097_s5, %s3616_s13  ;;  %p3620_p4 = scmp.lt.u32.totalorder %s3616_s13, %s4097_s5 }
0x110d   :  { %p3622_p5 = pnand %p3620_p4, %p3617_p3 }
0x110f   :  { %3625 = shalt.err (!%p3622_p5)
}
0x1110   :  { %2208 = dma.vmem_to_hbm [thread:$0]  %s2203_s9, 256, %s4097_s5, [#allocation4], %s3636_s30, %s3636_s30, %s3637_s6  }
0x1111   :  { %3632 = dma.done.wait [#allocation4], 256  }
0x1112   :  { %3633 = vsyncadd [#allocation4], 4294967040 }
0x1113   :  { %2212 = vsyncpa [#allocation3], 1 }
0x1114   :  { %2213 = vsyncpa [#allocation6], 1 }
0x1115   :  { %2214 = vsyncpa [#allocation9], 1 }
0x1116   :  { %2215 = vsyncpa [#allocation4], 1 }

</bundles_post_ra>
